<compile_context>
chip_gen: v5e
topology: v5e:2x2
jax: 0.10.0
libtpu: 0.0.40
codegen_flags: <defaults>
</compile_context>

<pallas_src>
import jax
import jax.numpy as jnp
from jax import lax
from jax.experimental import pallas as pl
from jax.experimental.pallas import tpu as pltpu


# ---------------- fused conv3x3 (stride 1, pad 1) + bias + ReLU + maxpool 2x2/2 ----------------
def _conv_relu_pool_kernel(cols_ref, w_ref, b_ref, o_ref):
    # cols_ref: (1, 9*Cin, 4*P) bf16  transposed im2col, pool-offset-major along N
    # w_ref:    (Cout, 9*Cin)   bf16
    # b_ref:    (Cout, 1)       f32
    # o_ref:    (1, Cout, P)    bf16  P = Ho*Wo (pooled spatial), lane-dense (>=256 lanes)
    P = o_ref.shape[2]
    w = w_ref[...]
    # Per pool-offset chunks (each a 128-aligned lane slab): four (Cout,P) MXU dots
    # combined with a running max -> the f32 intermediate never exceeds (Cout, P).
    pooled = jnp.dot(w, cols_ref[0, :, 0:P], preferred_element_type=jnp.float32)
    for i in range(1, 4):
        pooled = jnp.maximum(
            pooled,
            jnp.dot(w, cols_ref[0, :, i * P:(i + 1) * P],
                    preferred_element_type=jnp.float32))
    # bias + ReLU after the max (monotone, identical to relu-then-pool).
    o_ref[0] = jnp.maximum(pooled + b_ref[...], 0.0).astype(o_ref.dtype)


def _im2col_pool_major(x_nchw):
    """(B, Cin, H, W) -> (B, 9*Cin, 4*Ho*Wo) bf16 transposed im2col (glue: data movement only).

    K index: (ky*3 + kx) * Cin + c
    N index: (py*2 + px) * Ho*Wo + ho*Wo + wo     (2x2 pool offsets major)
    """
    B, Cin, H, W = x_nchw.shape
    Ho, Wo = H // 2, W // 2
    xp = jnp.pad(x_nchw.astype(jnp.bfloat16), ((0, 0), (0, 0), (1, 1), (1, 1)))
    taps = []
    for ky in range(3):
        for kx in range(3):
            offs = []
            for py in range(2):
                for px in range(2):
                    sl = lax.slice(
                        xp,
                        (0, 0, ky + py, kx + px),
                        (B, Cin, ky + py + 2 * Ho - 1, kx + px + 2 * Wo - 1),
                        (1, 1, 2, 2))                         # (B, Cin, Ho, Wo)
                    offs.append(sl.reshape(B, Cin, Ho * Wo))
            taps.append(jnp.concatenate(offs, axis=2))        # (B, Cin, 4*Ho*Wo)
    return jnp.concatenate(taps, axis=1)                       # (B, 9*Cin, 4*Ho*Wo) bf16


def conv_relu_pool(x_nchw, w_t, b_col):
    """x_nchw: (B,Cin,H,W); w_t: (Cout, 9*Cin) bf16; b_col: (Cout,1) f32
    -> (B, Cout, Ho*Wo) bf16 (NCHW flatten order)."""
    B, Cin, H, W = x_nchw.shape
    Cout = w_t.shape[0]
    K = 9 * Cin
    P = (H // 2) * (W // 2)
    cols = _im2col_pool_major(x_nchw)                          # (B, K, 4*P) bf16
    return pl.pallas_call(
        _conv_relu_pool_kernel,
        out_shape=jax.ShapeDtypeStruct((B, Cout, P), jnp.bfloat16),
        grid_spec=pltpu.PrefetchScalarGridSpec(
            num_scalar_prefetch=0,
            grid=(B,),
            in_specs=[
                pl.BlockSpec((1, K, 4 * P), lambda b: (b, 0, 0)),
                pl.BlockSpec((Cout, K), lambda b: (0, 0)),
                pl.BlockSpec((Cout, 1), lambda b: (0, 0)),
            ],
            out_specs=pl.BlockSpec((1, Cout, P), lambda b: (b, 0, 0)),
        ),
        compiler_params=pltpu.CompilerParams(dimension_semantics=("parallel",)),
    )(cols, w_t, b_col)


# -------------------------------- fc1 + ReLU + fc2 head ----------------------------------------
def _mlp_head_kernel(xi_ref, w1i_ref, xt_ref, w1t_ref, b1_ref, w2_ref, b2_ref,
                     o_ref, acc_ref):
    # Grid axis 0: reduction over the image-feature K dimension of fc1.
    k = pl.program_id(0)

    @pl.when(k == 0)
    def _():
        # Initialize with the (resident) text half + bias.
        acc_ref[...] = (jnp.dot(xt_ref[...], w1t_ref[...],
                                preferred_element_type=jnp.float32)
                        + b1_ref[...])

    acc_ref[...] += jnp.dot(xi_ref[...], w1i_ref[...],
                            preferred_element_type=jnp.float32)

    @pl.when(k == pl.num_programs(0) - 1)
    def _():
        h = jnp.maximum(acc_ref[...], 0.0).astype(w2_ref.dtype)
        o_ref[...] = (jnp.dot(h, w2_ref[...], preferred_element_type=jnp.float32)
                      + b2_ref[...])


def mlp_head(x_img, x_txt, w1_img, w1_txt, b1, w2, b2, *, tk=1024):
    """fc1 split into image/text halves (no (B, 8960) concat copy); K-grid streams w1_img."""
    B, K_img = x_img.shape
    H1 = w1_img.shape[1]
    Ktxt = x_txt.shape[1]
    Nout = w2.shape[1]
    nk = K_img // tk
    return pl.pallas_call(
        _mlp_head_kernel,
        out_shape=jax.ShapeDtypeStruct((B, Nout), jnp.float32),
        grid_spec=pltpu.PrefetchScalarGridSpec(
            num_scalar_prefetch=0,
            grid=(nk,),
            in_specs=[
                pl.BlockSpec((B, tk), lambda k: (0, k)),        # x_img chunk (streamed)
                pl.BlockSpec((tk, H1), lambda k: (k, 0)),       # w1_img chunk (streamed)
                pl.BlockSpec((B, Ktxt), lambda k: (0, 0)),      # x_txt (resident)
                pl.BlockSpec((Ktxt, H1), lambda k: (0, 0)),     # w1_txt (resident)
                pl.BlockSpec((1, H1), lambda k: (0, 0)),        # b1
                pl.BlockSpec((H1, Nout), lambda k: (0, 0)),     # w2
                pl.BlockSpec((1, Nout), lambda k: (0, 0)),      # b2
            ],
            out_specs=pl.BlockSpec((B, Nout), lambda k: (0, 0)),
            scratch_shapes=[pltpu.VMEM((B, H1), jnp.float32)],
        ),
        compiler_params=pltpu.CompilerParams(dimension_semantics=("arbitrary",)),
    )(x_img, w1_img, x_txt, w1_txt, b1, w2, b2)


# ----------------------------------- full forward pass -----------------------------------------
def prepare_params(params):
    """One-time (outside jit) repack of PyTorch-layout params into kernel layout (bf16 weights)."""
    c1w, c2w = params["conv1_w"], params["conv2_w"]
    cin1, cin2 = c1w.shape[2], c2w.shape[2]
    img_feat = 2 * 64 * 64                     # 32 ch * 16 * 16, NCHW flatten order
    return {
        "conv1_wt": jnp.transpose(c1w.reshape(9 * cin1, -1)).astype(jnp.bfloat16),  # (Cout, 9*Cin)
        "conv1_bc": params["conv1_b"].reshape(-1, 1).astype(jnp.float32),
        "conv2_wt": jnp.transpose(c2w.reshape(9 * cin2, -1)).astype(jnp.bfloat16),
        "conv2_bc": params["conv2_b"].reshape(-1, 1).astype(jnp.float32),
        "fc1_w_img": params["fc1_w"][:img_feat].astype(jnp.bfloat16),               # (8192, 128)
        "fc1_w_txt": params["fc1_w"][img_feat:].astype(jnp.bfloat16),               # (768, 128)
        "fc1_b": params["fc1_b"].reshape(1, -1).astype(jnp.float32),
        "fc2_w": params["fc2_w"].astype(jnp.bfloat16),
        "fc2_b": params["fc2_b"].reshape(1, -1).astype(jnp.float32),
    }


def multimodal_classifier_forward(kparams, image_nchw, bert_pooler_output):
    x = image_nchw                                                    # (B,3,64,64) NCHW
    x = conv_relu_pool(x, kparams["conv1_wt"], kparams["conv1_bc"])   # (B,16,1024) bf16 == NCHW (B,16,32,32)
    B = x.shape[0]
    x = x.reshape(B, 16, 32, 32)
    x = conv_relu_pool(x, kparams["conv2_wt"], kparams["conv2_bc"])   # (B,32,256) bf16 == NCHW (B,32,16,16)
    # TODO(synk): frozen pretrained BERT is not reproducible here; pooler_output is an input.
    x_img = x.reshape(B, -1)        # already NCHW-flatten order == torch x.view(B, -1); free reshape
    return mlp_head(x_img, bert_pooler_output.astype(jnp.bfloat16),
                    kparams["fc1_w_img"], kparams["fc1_w_txt"],
                    kparams["fc1_b"], kparams["fc2_w"], kparams["fc2_b"])  # (B, 7) f32


# ------------------------------- params / reference / main --------------------------------------
def init_params(key):
    ks = jax.random.split(key, 8)

    def w(k, shape, fan_in):
        return jax.random.normal(k, shape, jnp.float32) / jnp.sqrt(float(fan_in))

    return {
        "conv1_w": w(ks[0], (3, 3, 3, 16), 3 * 3 * 3),        # HWIO
        "conv1_b": w(ks[1], (16,), 3 * 3 * 3),
        "conv2_w": w(ks[2], (3, 3, 16, 32), 3 * 3 * 16),
        "conv2_b": w(ks[3], (32,), 3 * 3 * 16),
        "fc1_w":  w(ks[4], (2 * 64 * 64 + 768, 128), 2 * 64 * 64 + 768),
        "fc1_b":  w(ks[5], (128,), 2 * 64 * 64 + 768),
        "fc2_w":  w(ks[6], (128, 7), 128),
        "fc2_b":  w(ks[7], (7,), 128),
    }


def reference_forward(params, image_nchw, bert_pooler_output):
    x = image_nchw.astype(jnp.float32)

    def conv(x, w_hwio, b):
        y = lax.conv_general_dilated(x, w_hwio, (1, 1), "SAME",
                                     dimension_numbers=("NCHW", "HWIO", "NCHW"))
        return jax.nn.relu(y + b.reshape(1, -1, 1, 1))

    def pool(x):
        return lax.reduce_window(x, -jnp.inf, lax.max, (1, 1, 2, 2), (1, 1, 2, 2), "VALID")

    x = pool(conv(x, params["conv1_w"], params["conv1_b"]))
    x = pool(conv(x, params["conv2_w"], params["conv2_b"]))
    B = x.shape[0]
    x_img = x.reshape(B, -1)                                   # NCHW flatten, matches torch
    feat = jnp.concatenate([x_img, bert_pooler_output], axis=1)
    h = jax.nn.relu(feat @ params["fc1_w"] + params["fc1_b"])
    return h @ params["fc2_w"] + params["fc2_b"]


if __name__ == "__main__":
    key = jax.random.PRNGKey(0)
    kp, ki, kt = jax.random.split(key, 3)
    params = init_params(kp)
    kparams = prepare_params(params)                           # offline repack, zero cost per call
    image = jax.random.normal(ki, (2, 3, 64, 64), jnp.float32)       # NCHW, as PyTorch would pass
    bert_pooled = jax.random.normal(kt, (2, 768), jnp.float32)       # stands in for BERT pooler_output

    fwd = jax.jit(multimodal_classifier_forward)
    out = jax.block_until_ready(fwd(kparams, image, bert_pooled))
    assert out.shape == (2, 7)

    ref = reference_forward(params, image, bert_pooled)
    err = float(jnp.max(jnp.abs(out - ref)))
    assert jnp.allclose(out, ref, atol=1e-2, rtol=1e-2), err

    print("KERNEL_OK")
</pallas_src>

<mosaic_0001>
module attributes {stable_mosaic.version = 11 : i64} {
  func.func @_conv_relu_pool_kernel(%arg0: i32, %arg1: memref<1x27x4096xbf16, #tpu.memory_space<vmem>>, %arg2: memref<16x27xbf16, #tpu.memory_space<vmem>>, %arg3: memref<16x1xf32, #tpu.memory_space<vmem>>, %arg4: memref<1x16x1024xbf16, #tpu.memory_space<vmem>>) attributes {dimension_semantics = [#tpu.dimension_semantics<parallel>], iteration_bounds = array<i64: 2>, scalar_prefetch = 0 : i64, scratch_operands = 0 : i64, tpu.core_type = #tpu.core_type<tc>, window_params = [{transform_indices = @transform_0, window_bounds = array<i64: 1, 27, 4096>}, {pipeline_mode = #tpu.pipeline_mode<synchronous>, transform_indices = @transform_1, window_bounds = array<i64: 16, 27>}, {pipeline_mode = #tpu.pipeline_mode<synchronous>, transform_indices = @transform_2, window_bounds = array<i64: 16, 1>}, {transform_indices = @transform_3, window_bounds = array<i64: 1, 16, 1024>}]} {
    %c0 = arith.constant 0 : index
    %c0_0 = arith.constant 0 : index
    %0 = vector.load %arg2[%c0, %c0_0] : memref<16x27xbf16, #tpu.memory_space<vmem>>, vector<16x27xbf16>
    %c0_1 = arith.constant 0 : index
    %c0_2 = arith.constant 0 : index
    %c0_3 = arith.constant 0 : index
    %1 = vector.load %arg1[%c0_1, %c0_2, %c0_3] : memref<1x27x4096xbf16, #tpu.memory_space<vmem>>, vector<1x27x1024xbf16>
    %2 = vector.shape_cast %1 : vector<1x27x1024xbf16> to vector<27x1024xbf16>
    %cst = arith.constant dense<0.000000e+00> : vector<16x1024xf32>
    %3 = tpu.matmul %0, %2, %cst {dimension_numbers = #tpu.dot_dimension_numbers<[1], [0], [0], [1], [0, 0, 1, 1], [], []>} : vector<16x27xbf16>, vector<27x1024xbf16>, vector<16x1024xf32> -> vector<16x1024xf32>
    %c0_4 = arith.constant 0 : index
    %c0_5 = arith.constant 0 : index
    %c1024 = arith.constant 1024 : index
    %4 = vector.load %arg1[%c0_4, %c0_5, %c1024] : memref<1x27x4096xbf16, #tpu.memory_space<vmem>>, vector<1x27x1024xbf16>
    %5 = vector.shape_cast %4 : vector<1x27x1024xbf16> to vector<27x1024xbf16>
    %cst_6 = arith.constant dense<0.000000e+00> : vector<16x1024xf32>
    %6 = tpu.matmul %0, %5, %cst_6 {dimension_numbers = #tpu.dot_dimension_numbers<[1], [0], [0], [1], [0, 0, 1, 1], [], []>} : vector<16x27xbf16>, vector<27x1024xbf16>, vector<16x1024xf32> -> vector<16x1024xf32>
    %7 = arith.maximumf %3, %6 : vector<16x1024xf32>
    %c0_7 = arith.constant 0 : index
    %c0_8 = arith.constant 0 : index
    %c2048 = arith.constant 2048 : index
    %8 = vector.load %arg1[%c0_7, %c0_8, %c2048] : memref<1x27x4096xbf16, #tpu.memory_space<vmem>>, vector<1x27x1024xbf16>
    %9 = vector.shape_cast %8 : vector<1x27x1024xbf16> to vector<27x1024xbf16>
    %cst_9 = arith.constant dense<0.000000e+00> : vector<16x1024xf32>
    %10 = tpu.matmul %0, %9, %cst_9 {dimension_numbers = #tpu.dot_dimension_numbers<[1], [0], [0], [1], [0, 0, 1, 1], [], []>} : vector<16x27xbf16>, vector<27x1024xbf16>, vector<16x1024xf32> -> vector<16x1024xf32>
    %11 = arith.maximumf %7, %10 : vector<16x1024xf32>
    %c0_10 = arith.constant 0 : index
    %c0_11 = arith.constant 0 : index
    %c3072 = arith.constant 3072 : index
    %12 = vector.load %arg1[%c0_10, %c0_11, %c3072] : memref<1x27x4096xbf16, #tpu.memory_space<vmem>>, vector<1x27x1024xbf16>
    %13 = vector.shape_cast %12 : vector<1x27x1024xbf16> to vector<27x1024xbf16>
    %cst_12 = arith.constant dense<0.000000e+00> : vector<16x1024xf32>
    %14 = tpu.matmul %0, %13, %cst_12 {dimension_numbers = #tpu.dot_dimension_numbers<[1], [0], [0], [1], [0, 0, 1, 1], [], []>} : vector<16x27xbf16>, vector<27x1024xbf16>, vector<16x1024xf32> -> vector<16x1024xf32>
    %15 = arith.maximumf %11, %14 : vector<16x1024xf32>
    %c0_13 = arith.constant 0 : index
    %c0_14 = arith.constant 0 : index
    %16 = vector.load %arg3[%c0_13, %c0_14] : memref<16x1xf32, #tpu.memory_space<vmem>>, vector<16x1xf32>
    %17 = vector.broadcast %16 : vector<16x1xf32> to vector<16x1024xf32>
    %18 = arith.addf %15, %17 : vector<16x1024xf32>
    %cst_15 = arith.constant 0.000000e+00 : f32
    %19 = vector.broadcast %cst_15 : f32 to vector<16x1024xf32>
    %20 = arith.maximumf %18, %19 : vector<16x1024xf32>
    %21 = arith.truncf %20 : vector<16x1024xf32> to vector<16x1024xbf16>
    %c0_16 = arith.constant 0 : index
    %c0_17 = arith.constant 0 : index
    %c0_18 = arith.constant 0 : index
    %22 = vector.load %arg4[%c0_16, %c0_17, %c0_18] : memref<1x16x1024xbf16, #tpu.memory_space<vmem>>, vector<1x16x1024xbf16>
    %23 = vector.shape_cast %22 : vector<1x16x1024xbf16> to vector<16x1024xbf16>
    %24 = vector.shape_cast %21 : vector<16x1024xbf16> to vector<1x16x1024xbf16>
    tpu.vector_store %arg4[%c0_16, %c0_17, %c0_18], %24 {strides = array<i32>} : memref<1x16x1024xbf16, #tpu.memory_space<vmem>>, vector<1x16x1024xbf16>,
    return
  }
  func.func @transform_0(%arg0: i32) -> (i32, i32, i32) {
    %c0_i32 = arith.constant 0 : i32
    %c0_i32_0 = arith.constant 0 : i32
    %c0_i32_1 = arith.constant 0 : i32
    return %arg0, %c0_i32, %c0_i32_0 : i32, i32, i32
  }
  func.func @transform_1(%arg0: i32) -> (i32, i32) {
    %c0_i32 = arith.constant 0 : i32
    %c0_i32_0 = arith.constant 0 : i32
    %c0_i32_1 = arith.constant 0 : i32
    return %c0_i32, %c0_i32_0 : i32, i32
  }
  func.func @transform_2(%arg0: i32) -> (i32, i32) {
    %c0_i32 = arith.constant 0 : i32
    %c0_i32_0 = arith.constant 0 : i32
    %c0_i32_1 = arith.constant 0 : i32
    return %c0_i32, %c0_i32_0 : i32, i32
  }
  func.func @transform_3(%arg0: i32) -> (i32, i32, i32) {
    %c0_i32 = arith.constant 0 : i32
    %c0_i32_0 = arith.constant 0 : i32
    %c0_i32_1 = arith.constant 0 : i32
    return %arg0, %c0_i32, %c0_i32_0 : i32, i32, i32
  }
}

module attributes {stable_mosaic.version = 11 : i64} {
  func.func @_conv_relu_pool_kernel(%arg0: i32, %arg1: memref<1x144x1024xbf16, #tpu.memory_space<vmem>>, %arg2: memref<32x144xbf16, #tpu.memory_space<vmem>>, %arg3: memref<32x1xf32, #tpu.memory_space<vmem>>, %arg4: memref<1x32x256xbf16, #tpu.memory_space<vmem>>) attributes {dimension_semantics = [#tpu.dimension_semantics<parallel>], iteration_bounds = array<i64: 2>, scalar_prefetch = 0 : i64, scratch_operands = 0 : i64, tpu.core_type = #tpu.core_type<tc>, window_params = [{transform_indices = @transform_0, window_bounds = array<i64: 1, 144, 1024>}, {pipeline_mode = #tpu.pipeline_mode<synchronous>, transform_indices = @transform_1, window_bounds = array<i64: 32, 144>}, {pipeline_mode = #tpu.pipeline_mode<synchronous>, transform_indices = @transform_2, window_bounds = array<i64: 32, 1>}, {transform_indices = @transform_3, window_bounds = array<i64: 1, 32, 256>}]} {
    %c0 = arith.constant 0 : index
    %c0_0 = arith.constant 0 : index
    %0 = vector.load %arg2[%c0, %c0_0] : memref<32x144xbf16, #tpu.memory_space<vmem>>, vector<32x144xbf16>
    %c0_1 = arith.constant 0 : index
    %c0_2 = arith.constant 0 : index
    %c0_3 = arith.constant 0 : index
    %1 = vector.load %arg1[%c0_1, %c0_2, %c0_3] : memref<1x144x1024xbf16, #tpu.memory_space<vmem>>, vector<1x144x256xbf16>
    %2 = vector.shape_cast %1 : vector<1x144x256xbf16> to vector<144x256xbf16>
    %cst = arith.constant dense<0.000000e+00> : vector<32x256xf32>
    %3 = tpu.matmul %0, %2, %cst {dimension_numbers = #tpu.dot_dimension_numbers<[1], [0], [0], [1], [0, 0, 1, 1], [], []>} : vector<32x144xbf16>, vector<144x256xbf16>, vector<32x256xf32> -> vector<32x256xf32>
    %c0_4 = arith.constant 0 : index
    %c0_5 = arith.constant 0 : index
    %c256 = arith.constant 256 : index
    %4 = vector.load %arg1[%c0_4, %c0_5, %c256] : memref<1x144x1024xbf16, #tpu.memory_space<vmem>>, vector<1x144x256xbf16>
    %5 = vector.shape_cast %4 : vector<1x144x256xbf16> to vector<144x256xbf16>
    %cst_6 = arith.constant dense<0.000000e+00> : vector<32x256xf32>
    %6 = tpu.matmul %0, %5, %cst_6 {dimension_numbers = #tpu.dot_dimension_numbers<[1], [0], [0], [1], [0, 0, 1, 1], [], []>} : vector<32x144xbf16>, vector<144x256xbf16>, vector<32x256xf32> -> vector<32x256xf32>
    %7 = arith.maximumf %3, %6 : vector<32x256xf32>
    %c0_7 = arith.constant 0 : index
    %c0_8 = arith.constant 0 : index
    %c512 = arith.constant 512 : index
    %8 = vector.load %arg1[%c0_7, %c0_8, %c512] : memref<1x144x1024xbf16, #tpu.memory_space<vmem>>, vector<1x144x256xbf16>
    %9 = vector.shape_cast %8 : vector<1x144x256xbf16> to vector<144x256xbf16>
    %cst_9 = arith.constant dense<0.000000e+00> : vector<32x256xf32>
    %10 = tpu.matmul %0, %9, %cst_9 {dimension_numbers = #tpu.dot_dimension_numbers<[1], [0], [0], [1], [0, 0, 1, 1], [], []>} : vector<32x144xbf16>, vector<144x256xbf16>, vector<32x256xf32> -> vector<32x256xf32>
    %11 = arith.maximumf %7, %10 : vector<32x256xf32>
    %c0_10 = arith.constant 0 : index
    %c0_11 = arith.constant 0 : index
    %c768 = arith.constant 768 : index
    %12 = vector.load %arg1[%c0_10, %c0_11, %c768] : memref<1x144x1024xbf16, #tpu.memory_space<vmem>>, vector<1x144x256xbf16>
    %13 = vector.shape_cast %12 : vector<1x144x256xbf16> to vector<144x256xbf16>
    %cst_12 = arith.constant dense<0.000000e+00> : vector<32x256xf32>
    %14 = tpu.matmul %0, %13, %cst_12 {dimension_numbers = #tpu.dot_dimension_numbers<[1], [0], [0], [1], [0, 0, 1, 1], [], []>} : vector<32x144xbf16>, vector<144x256xbf16>, vector<32x256xf32> -> vector<32x256xf32>
    %15 = arith.maximumf %11, %14 : vector<32x256xf32>
    %c0_13 = arith.constant 0 : index
    %c0_14 = arith.constant 0 : index
    %16 = vector.load %arg3[%c0_13, %c0_14] : memref<32x1xf32, #tpu.memory_space<vmem>>, vector<32x1xf32>
    %17 = vector.broadcast %16 : vector<32x1xf32> to vector<32x256xf32>
    %18 = arith.addf %15, %17 : vector<32x256xf32>
    %cst_15 = arith.constant 0.000000e+00 : f32
    %19 = vector.broadcast %cst_15 : f32 to vector<32x256xf32>
    %20 = arith.maximumf %18, %19 : vector<32x256xf32>
    %21 = arith.truncf %20 : vector<32x256xf32> to vector<32x256xbf16>
    %c0_16 = arith.constant 0 : index
    %c0_17 = arith.constant 0 : index
    %c0_18 = arith.constant 0 : index
    %22 = vector.load %arg4[%c0_16, %c0_17, %c0_18] : memref<1x32x256xbf16, #tpu.memory_space<vmem>>, vector<1x32x256xbf16>
    %23 = vector.shape_cast %22 : vector<1x32x256xbf16> to vector<32x256xbf16>
    %24 = vector.shape_cast %21 : vector<32x256xbf16> to vector<1x32x256xbf16>
    tpu.vector_store %arg4[%c0_16, %c0_17, %c0_18], %24 {strides = array<i32>} : memref<1x32x256xbf16, #tpu.memory_space<vmem>>, vector<1x32x256xbf16>,
    return
  }
  func.func @transform_0(%arg0: i32) -> (i32, i32, i32) {
    %c0_i32 = arith.constant 0 : i32
    %c0_i32_0 = arith.constant 0 : i32
    %c0_i32_1 = arith.constant 0 : i32
    return %arg0, %c0_i32, %c0_i32_0 : i32, i32, i32
  }
  func.func @transform_1(%arg0: i32) -> (i32, i32) {
    %c0_i32 = arith.constant 0 : i32
    %c0_i32_0 = arith.constant 0 : i32
    %c0_i32_1 = arith.constant 0 : i32
    return %c0_i32, %c0_i32_0 : i32, i32
  }
  func.func @transform_2(%arg0: i32) -> (i32, i32) {
    %c0_i32 = arith.constant 0 : i32
    %c0_i32_0 = arith.constant 0 : i32
    %c0_i32_1 = arith.constant 0 : i32
    return %c0_i32, %c0_i32_0 : i32, i32
  }
  func.func @transform_3(%arg0: i32) -> (i32, i32, i32) {
    %c0_i32 = arith.constant 0 : i32
    %c0_i32_0 = arith.constant 0 : i32
    %c0_i32_1 = arith.constant 0 : i32
    return %arg0, %c0_i32, %c0_i32_0 : i32, i32, i32
  }
}

module attributes {stable_mosaic.version = 11 : i64} {
  func.func @_mlp_head_kernel(%arg0: i32, %arg1: memref<2x1024xbf16, #tpu.memory_space<vmem>>, %arg2: memref<1024x128xbf16, #tpu.memory_space<vmem>>, %arg3: memref<2x768xbf16, #tpu.memory_space<vmem>>, %arg4: memref<768x128xbf16, #tpu.memory_space<vmem>>, %arg5: memref<1x128xf32, #tpu.memory_space<vmem>>, %arg6: memref<128x7xbf16, #tpu.memory_space<vmem>>, %arg7: memref<1x7xf32, #tpu.memory_space<vmem>>, %arg8: memref<2x7xf32, #tpu.memory_space<vmem>>, %arg9: memref<2x128xf32, #tpu.memory_space<vmem>>) attributes {dimension_semantics = [#tpu.dimension_semantics<arbitrary>], iteration_bounds = array<i64: 8>, scalar_prefetch = 0 : i64, scratch_operands = 1 : i64, tpu.core_type = #tpu.core_type<tc>, window_params = [{transform_indices = @transform_0, window_bounds = array<i64: 2, 1024>}, {transform_indices = @transform_1, window_bounds = array<i64: 1024, 128>}, {pipeline_mode = #tpu.pipeline_mode<synchronous>, transform_indices = @transform_2, window_bounds = array<i64: 2, 768>}, {pipeline_mode = #tpu.pipeline_mode<synchronous>, transform_indices = @transform_3, window_bounds = array<i64: 768, 128>}, {pipeline_mode = #tpu.pipeline_mode<synchronous>, transform_indices = @transform_4, window_bounds = array<i64: 1, 128>}, {pipeline_mode = #tpu.pipeline_mode<synchronous>, transform_indices = @transform_5, window_bounds = array<i64: 128, 7>}, {pipeline_mode = #tpu.pipeline_mode<synchronous>, transform_indices = @transform_6, window_bounds = array<i64: 1, 7>}, {pipeline_mode = #tpu.pipeline_mode<synchronous>, transform_indices = @transform_7, window_bounds = array<i64: 2, 7>}]} {
    %c0_i32 = arith.constant 0 : i32
    %0 = arith.cmpi eq, %arg0, %c0_i32 : i32
    %1 = arith.extui %0 : i1 to i32
    %c0_i32_0 = arith.constant 0 : i32
    %2 = arith.cmpi ne, %1, %c0_i32_0 : i32
    scf.if %2 {
      %c0_9 = arith.constant 0 : index
      %c0_10 = arith.constant 0 : index
      %12 = vector.load %arg3[%c0_9, %c0_10] : memref<2x768xbf16, #tpu.memory_space<vmem>>, vector<2x768xbf16>
      %c0_11 = arith.constant 0 : index
      %c0_12 = arith.constant 0 : index
      %13 = vector.load %arg4[%c0_11, %c0_12] : memref<768x128xbf16, #tpu.memory_space<vmem>>, vector<768x128xbf16>
      %cst_13 = arith.constant dense<0.000000e+00> : vector<2x128xf32>
      %14 = tpu.matmul %12, %13, %cst_13 {dimension_numbers = #tpu.dot_dimension_numbers<[1], [0], [0], [1], [0, 0, 1, 1], [], []>} : vector<2x768xbf16>, vector<768x128xbf16>, vector<2x128xf32> -> vector<2x128xf32>
      %c0_14 = arith.constant 0 : index
      %c0_15 = arith.constant 0 : index
      %15 = vector.load %arg5[%c0_14, %c0_15] : memref<1x128xf32, #tpu.memory_space<vmem>>, vector<1x128xf32>
      %16 = vector.broadcast %15 : vector<1x128xf32> to vector<2x128xf32>
      %17 = arith.addf %14, %16 : vector<2x128xf32>
      %c0_16 = arith.constant 0 : index
      %c0_17 = arith.constant 0 : index
      %18 = vector.load %arg9[%c0_16, %c0_17] : memref<2x128xf32, #tpu.memory_space<vmem>>, vector<2x128xf32>
      tpu.vector_store %arg9[%c0_16, %c0_17], %17 {strides = array<i32>} : memref<2x128xf32, #tpu.memory_space<vmem>>, vector<2x128xf32>,
    } else {
    }
    %c0 = arith.constant 0 : index
    %c0_1 = arith.constant 0 : index
    %3 = vector.load %arg9[%c0, %c0_1] : memref<2x128xf32, #tpu.memory_space<vmem>>, vector<2x128xf32>
    %c0_2 = arith.constant 0 : index
    %c0_3 = arith.constant 0 : index
    %4 = vector.load %arg1[%c0_2, %c0_3] : memref<2x1024xbf16, #tpu.memory_space<vmem>>, vector<2x1024xbf16>
    %c0_4 = arith.constant 0 : index
    %c0_5 = arith.constant 0 : index
    %5 = vector.load %arg2[%c0_4, %c0_5] : memref<1024x128xbf16, #tpu.memory_space<vmem>>, vector<1024x128xbf16>
    %cst = arith.constant dense<0.000000e+00> : vector<2x128xf32>
    %6 = tpu.matmul %4, %5, %cst {dimension_numbers = #tpu.dot_dimension_numbers<[1], [0], [0], [1], [0, 0, 1, 1], [], []>} : vector<2x1024xbf16>, vector<1024x128xbf16>, vector<2x128xf32> -> vector<2x128xf32>
    %7 = arith.addf %3, %6 : vector<2x128xf32>
    %c0_6 = arith.constant 0 : index
    %c0_7 = arith.constant 0 : index
    %8 = vector.load %arg9[%c0_6, %c0_7] : memref<2x128xf32, #tpu.memory_space<vmem>>, vector<2x128xf32>
    tpu.vector_store %arg9[%c0_6, %c0_7], %7 {strides = array<i32>} : memref<2x128xf32, #tpu.memory_space<vmem>>, vector<2x128xf32>,
    %c7_i32 = arith.constant 7 : i32
    %9 = arith.cmpi eq, %arg0, %c7_i32 : i32
    %10 = arith.extui %9 : i1 to i32
    %c0_i32_8 = arith.constant 0 : i32
    %11 = arith.cmpi ne, %10, %c0_i32_8 : i32
    scf.if %11 {
      %c0_9 = arith.constant 0 : index
      %c0_10 = arith.constant 0 : index
      %12 = vector.load %arg9[%c0_9, %c0_10] : memref<2x128xf32, #tpu.memory_space<vmem>>, vector<2x128xf32>
      %cst_11 = arith.constant 0.000000e+00 : f32
      %13 = vector.broadcast %cst_11 : f32 to vector<2x128xf32>
      %14 = arith.maximumf %12, %13 : vector<2x128xf32>
      %15 = arith.truncf %14 : vector<2x128xf32> to vector<2x128xbf16>
      %c0_12 = arith.constant 0 : index
      %c0_13 = arith.constant 0 : index
      %16 = vector.load %arg6[%c0_12, %c0_13] : memref<128x7xbf16, #tpu.memory_space<vmem>>, vector<128x7xbf16>
      %cst_14 = arith.constant dense<0.000000e+00> : vector<2x7xf32>
      %17 = tpu.matmul %15, %16, %cst_14 {dimension_numbers = #tpu.dot_dimension_numbers<[1], [0], [0], [1], [0, 0, 1, 1], [], []>} : vector<2x128xbf16>, vector<128x7xbf16>, vector<2x7xf32> -> vector<2x7xf32>
      %c0_15 = arith.constant 0 : index
      %c0_16 = arith.constant 0 : index
      %18 = vector.load %arg7[%c0_15, %c0_16] : memref<1x7xf32, #tpu.memory_space<vmem>>, vector<1x7xf32>
      %19 = vector.broadcast %18 : vector<1x7xf32> to vector<2x7xf32>
      %20 = arith.addf %17, %19 : vector<2x7xf32>
      %c0_17 = arith.constant 0 : index
      %c0_18 = arith.constant 0 : index
      %21 = vector.load %arg8[%c0_17, %c0_18] : memref<2x7xf32, #tpu.memory_space<vmem>>, vector<2x7xf32>
      tpu.vector_store %arg8[%c0_17, %c0_18], %20 {strides = array<i32>} : memref<2x7xf32, #tpu.memory_space<vmem>>, vector<2x7xf32>,
    } else {
    }
    return
  }
  func.func @transform_0(%arg0: i32) -> (i32, i32) {
    %c0_i32 = arith.constant 0 : i32
    %c0_i32_0 = arith.constant 0 : i32
    return %c0_i32, %arg0 : i32, i32
  }
  func.func @transform_1(%arg0: i32) -> (i32, i32) {
    %c0_i32 = arith.constant 0 : i32
    %c0_i32_0 = arith.constant 0 : i32
    return %arg0, %c0_i32 : i32, i32
  }
  func.func @transform_2(%arg0: i32) -> (i32, i32) {
    %c0_i32 = arith.constant 0 : i32
    %c0_i32_0 = arith.constant 0 : i32
    %c0_i32_1 = arith.constant 0 : i32
    return %c0_i32, %c0_i32_0 : i32, i32
  }
  func.func @transform_3(%arg0: i32) -> (i32, i32) {
    %c0_i32 = arith.constant 0 : i32
    %c0_i32_0 = arith.constant 0 : i32
    %c0_i32_1 = arith.constant 0 : i32
    return %c0_i32, %c0_i32_0 : i32, i32
  }
  func.func @transform_4(%arg0: i32) -> (i32, i32) {
    %c0_i32 = arith.constant 0 : i32
    %c0_i32_0 = arith.constant 0 : i32
    %c0_i32_1 = arith.constant 0 : i32
    return %c0_i32, %c0_i32_0 : i32, i32
  }
  func.func @transform_5(%arg0: i32) -> (i32, i32) {
    %c0_i32 = arith.constant 0 : i32
    %c0_i32_0 = arith.constant 0 : i32
    %c0_i32_1 = arith.constant 0 : i32
    return %c0_i32, %c0_i32_0 : i32, i32
  }
  func.func @transform_6(%arg0: i32) -> (i32, i32) {
    %c0_i32 = arith.constant 0 : i32
    %c0_i32_0 = arith.constant 0 : i32
    %c0_i32_1 = arith.constant 0 : i32
    return %c0_i32, %c0_i32_0 : i32, i32
  }
  func.func @transform_7(%arg0: i32) -> (i32, i32) {
    %c0_i32 = arith.constant 0 : i32
    %c0_i32_0 = arith.constant 0 : i32
    %c0_i32_1 = arith.constant 0 : i32
    return %c0_i32, %c0_i32_0 : i32, i32
  }
}

</mosaic_0001>

<bundles_post_ra>
// kernel: multimodal_classifier_forward.3
= control target key start
LH: loop header
LB: loop body
LE: loop exit
PB: predicated region body
PF: predicated region fallthrough
CT: control target
= control target key end

     0   :  { %s1657_s12 = smov 0   ;;  %s2037_s0 = inlined_call_operand.vmem [shape: bf16[2,27,4096], index: 0, kind: input, shape index: {}]   ;;  %s2038_s1 = inlined_call_operand.vmem [shape: bf16[16,27], index: 1, kind: input, shape index: {}]   ;;  %s2039_s2 = inlined_call_operand.vmem [shape: f32[16,1], index: 2, kind: input, shape index: {}]   ;;  %s2040_s3 = inlined_call_operand.vmem [shape: bf16[2,16,1024], index: 3, kind: output, shape index: {}]  }
   0x1 LB: > { %s1246_s13 = sadd.s32 4294967295, %s1633_s12   ;;  %p1250_p0 = scmp.ge.s32.totalorder %s1633_s12, 1  ;;  %s1633_s12 = sphi %s1657_s12, %s13_s12  }
   0x2   : > { %p137_p1 = scmp.lt.s32.totalorder %s1633_s12, 3 }
   0x4   : > { %p138_p2 = pnand %p1250_p0, %p137_p1 }
   0x5   : > { %p161_p3 = scmp.lt.s32.totalorder (!%p138_p2), %s1246_s13, 1 }
   0x6   : > { %141 = sbr.rel (%p138_p2) target bundleno = 290 (0x122), region = 32 }
   0xb   : > { %vm271_vm0 = vcmask 1044480   ;;  %s2042_s13 = smov (!%p161_p3, %s1246_s13), 1  ;;  %vm272_vm1 = vcmask 1045504   ;;  %v1635_v0 = vmov 65535   ;;  %vm267_vm2 = vcmask 220160   ;;  %v1700_v32 = vld [vmem:[%s2038_s1] sm:$0xff] }
   0xc   : > { %v273_v1 = vsel %vm271_vm0, 4294967295, %v1635_v0  ;;  %s1549_s14 = sshll.u32 %s2042_s13, 9  ;;  %s1550_s24 = sshll.u32 %s2042_s13, 6 }
   0xd   : > { %s1671_s17 = scalar_lea.vmem %s2037_s0, %s1549_s14  ;;  %v1673_v2 = vsel %vm272_vm1, %v273_v1, 0  ;;  %s1982_s27 = scalar_lea.vmem %s2040_s3, %s1550_s24 }
   0xe   : > { %v1293_v3 = vld [vmem:[%s1671_s17 + $0x100] sm:$0xf]  ;;  %v1560_v5 = vld [vmem:[%s1671_s17 + $0x104] sm:$0xf]  ;;  %v1301_v8 = vld [vmem:[%s1671_s17 + $0x108] sm:$0xf] }
   0xf   : > { %v1564_v4 = vld [vmem:[%s1671_s17 + $0x17c] sm:$0x30]  ;;  %v1295_v7 = vld [vmem:[%s1671_s17 + $0x180] sm:$0x30]  ;;  %v1565_v9 = vld [vmem:[%s1671_s17 + $0x184] sm:$0x30] }
  0x10   : > { %v1294_v6 = vor.u32 %v1564_v4, %v1293_v3  ;;  %v1298_v10 = vor.u32 %v1560_v5, %v1295_v7  ;;  %v1302_v11 = vor.u32 %v1565_v9, %v1301_v8  ;;  %v1561_v12 = vld [vmem:[%s1671_s17 + $0x10c] sm:$0xf]  ;;  %v1261_v14 = vld [vmem:[%s1671_s17] sm:$0xf]  ;;  %v1552_v18 = vld [vmem:[%s1671_s17 + $0x4] sm:$0xf] }
  0x11   : > { %v1303_v13 = vld [vmem:[%s1671_s17 + $0x188] sm:$0x30]  ;;  %v1556_v17 = vld [vmem:[%s1671_s17 + $0x7c] sm:$0xf0]  ;;  %v1263_v19 = vld [vmem:[%s1671_s17 + $0x80] sm:$0xf0] }
  0x12   : > { %v276_v15 = vand.u32 %v1294_v6, %v1673_v2  ;;  %v1306_v16 = vor.u32 %v1561_v12, %v1303_v13  ;;  %v279_v20 = vand.u32 %v1298_v10, %v1673_v2  ;;  %v282_v21 = vand.u32 %v1302_v11, %v1673_v2  ;;  %v1269_v22 = vld [vmem:[%s1671_s17 + $0x8] sm:$0xf]  ;;  %v1553_v24 = vld [vmem:[%s1671_s17 + $0xc] sm:$0xf]  ;;  %v1317_v28 = vld [vmem:[%s1671_s17 + $0x118] sm:$0xf] }
  0x13   : > { %v1557_v23 = vld [vmem:[%s1671_s17 + $0x84] sm:$0xf0]  ;;  %v1262_v26 = vor.u32 %v1556_v17, %v1261_v14  ;;  %v1271_v27 = vld [vmem:[%s1671_s17 + $0x88] sm:$0xf0]  ;;  %v1567_v29 = vld [vmem:[%s1671_s17 + $0x194] sm:$0x30]  ;;  %v1266_v30 = vor.u32 %v1552_v18, %v1263_v19 }
  0x14   : > { %305 = vmatpush.bf16.msra.mxu0 %v276_v15  ;;  %v285_v25 = vand.u32 %v1306_v16, %v1673_v2  ;;  %319 = vmatpush.bf16.msra.mxu1 %v279_v20  ;;  %v1270_v31 = vor.u32 %v1557_v23, %v1269_v22  ;;  %v1318_v33 = vor.u32 %v1567_v29, %v1317_v28  ;;  %v1563_v34 = vld [vmem:[%s1671_s17 + $0x11c] sm:$0xf]  ;;  %v1309_v36 = vld [vmem:[%s1671_s17 + $0x110] sm:$0xf]  ;;  %v1562_v40 = vld [vmem:[%s1671_s17 + $0x114] sm:$0xf] }
  0x15   : > { %333 = vmatpush.bf16.msra.mxu2 %v282_v21  ;;  %v1319_v35 = vld [vmem:[%s1671_s17 + $0x198] sm:$0x30]  ;;  %v1274_v37 = vor.u32 %v1553_v24, %v1271_v27  ;;  %v1566_v39 = vld [vmem:[%s1671_s17 + $0x18c] sm:$0x30]  ;;  %v1311_v41 = vld [vmem:[%s1671_s17 + $0x190] sm:$0x30] }
  0x16   : > { %347 = vmatpush.bf16.msra.mxu3 %v285_v25  ;;  %v1322_v38 = vor.u32 %v1563_v34, %v1319_v35  ;;  %v294_v42 = vand.u32 %v1318_v33, %v1673_v2  ;;  %v1310_v43 = vor.u32 %v1566_v39, %v1309_v36  ;;  %v1314_v44 = vor.u32 %v1562_v40, %v1311_v41  ;;  %v1285_v45 = vld [vmem:[%s1671_s17 + $0x18] sm:$0xf]  ;;  %v1555_v47 = vld [vmem:[%s1671_s17 + $0x1c] sm:$0xf]  ;;  %v1277_v50 = vld [vmem:[%s1671_s17 + $0x10] sm:$0xf] }
  0x17   : > { %v1559_v46 = vld [vmem:[%s1671_s17 + $0x94] sm:$0xf0]  ;;  %v1287_v49 = vld [vmem:[%s1671_s17 + $0x98] sm:$0xf0]  ;;  %v1558_v51 = vld [vmem:[%s1671_s17 + $0x8c] sm:$0xf0] }
  0x18   : > { %306 = vmatpush.bf16.msra.mxu0 %v1262_v26  ;;  %v297_v48 = vand.u32 %v1322_v38, %v1673_v2  ;;  %320 = vmatpush.bf16.msra.mxu1 %v1266_v30  ;;  %v288_v52 = vand.u32 %v1310_v43, %v1673_v2  ;;  %v1554_v53 = vld [vmem:[%s1671_s17 + $0x14] sm:$0xf]  ;;  %v1373_v55 = vld [vmem:[%s1671_s17 + $0x128] sm:$0xf]  ;;  %v291_v56 = vand.u32 %v1314_v44, %v1673_v2  ;;  %v1577_v59 = vld [vmem:[%s1671_s17 + $0x12c] sm:$0xf] }
  0x19   : > { %334 = vmatpush.bf16.msra.mxu2 %v1270_v31  ;;  %v1279_v54 = vld [vmem:[%s1671_s17 + $0x90] sm:$0xf0]  ;;  %v1286_v57 = vor.u32 %v1559_v46, %v1285_v45  ;;  %v1581_v58 = vld [vmem:[%s1671_s17 + $0x1a4] sm:$0x30]  ;;  %v1375_v60 = vld [vmem:[%s1671_s17 + $0x1a8] sm:$0x30]  ;;  %v1290_v61 = vor.u32 %v1555_v47, %v1287_v49  ;;  %v1278_v4 = vor.u32 %v1558_v51, %v1277_v50 }
  0x1a   : > { %348 = vmatpush.bf16.msra.mxu3 %v1274_v37  ;;  %v1374_v62 = vor.u32 %v1581_v58, %v1373_v55  ;;  %v1378_v63 = vor.u32 %v1577_v59, %v1375_v60  ;;  %v1365_v0 = vld [vmem:[%s1671_s17 + $0x120] sm:$0xf]  ;;  %v1576_v3 = vld [vmem:[%s1671_s17 + $0x124] sm:$0xf]  ;;  %v1341_v7 = vld [vmem:[%s1671_s17 + $0x28] sm:$0xf]  ;;  %v1282_v14 = vor.u32 %v1554_v53, %v1279_v54 }
  0x1b   : > { %1323 = vmatmul.msk.bf16.vlgmr.msra.gmra.mxu0 %vm267_vm2, %v1700_v32  ;;  %v1580_v1 = vld [vmem:[%s1671_s17 + $0x19c] sm:$0x30]  ;;  %1324 = vmatmul.msk.bf16.vlgmr.msra.gmra.mxu1 %vm267_vm2, %v1700_v32  ;;  %v1367_v6 = vld [vmem:[%s1671_s17 + $0x1a0] sm:$0x30]  ;;  %v1573_v8 = vld [vmem:[%s1671_s17 + $0xa4] sm:$0xf0] }
  0x1c   : > { %1325 = vmatmul.msk.bf16.vlgmr.msra.gmra.mxu2 %vm267_vm2, %v1700_v32  ;;  %v1366_v5 = vor.u32 %v1580_v1, %v1365_v0  ;;  %361 = vmatpush.bf16.msrb.mxu0 %v288_v52  ;;  %v506_v9 = vand.u32 %v1374_v62, %v1673_v2  ;;  %v509_v10 = vand.u32 %v1378_v63, %v1673_v2  ;;  %v1569_v12 = vld [vmem:[%s1671_s17 + $0x2c] sm:$0xf]  ;;  %v1333_v18 = vld [vmem:[%s1671_s17 + $0x20] sm:$0xf]  ;;  %v1568_v21 = vld [vmem:[%s1671_s17 + $0x24] sm:$0xf] }
  0x1d   : > { %389 = vmatpush.bf16.msrb.mxu2 %v294_v42  ;;  %1326 = vmatmul.msk.bf16.vlgmr.msra.gmra.mxu3 %vm267_vm2, %v1700_v32  ;;  %v1370_v11 = vor.u32 %v1576_v3, %v1367_v6  ;;  %v1343_v13 = vld [vmem:[%s1671_s17 + $0xa8] sm:$0xf0]  ;;  %v1342_v17 = vor.u32 %v1573_v8, %v1341_v7  ;;  %v1572_v19 = vld [vmem:[%s1671_s17 + $0x9c] sm:$0xf0]  ;;  %v1335_v22 = vld [vmem:[%s1671_s17 + $0xa0] sm:$0xf0] }
  0x1e   : > { %403 = vmatpush.bf16.msrb.mxu3 %v297_v48  ;;  %375 = vmatpush.bf16.msrb.mxu1 %v291_v56  ;;  %v500_v15 = vand.u32 %v1366_v5, %v1673_v2  ;;  %v1346_v20 = vor.u32 %v1569_v12, %v1343_v13  ;;  %v1334_v23 = vor.u32 %v1572_v19, %v1333_v18  ;;  %v1389_v24 = vld [vmem:[%s1671_s17 + $0x138] sm:$0xf]  ;;  %v1579_v26 = vld [vmem:[%s1671_s17 + $0x13c] sm:$0xf]  ;;  %v1381_v29 = vld [vmem:[%s1671_s17 + $0x130] sm:$0xf] }
  0x1f   : > { %v503_v16 = vand.u32 %v1370_v11, %v1673_v2  ;;  %v1583_v25 = vld [vmem:[%s1671_s17 + $0x1b4] sm:$0x30]  ;;  %v1338_v27 = vor.u32 %v1568_v21, %v1335_v22  ;;  %v1391_v28 = vld [vmem:[%s1671_s17 + $0x1b8] sm:$0x30]  ;;  %v1582_v30 = vld [vmem:[%s1671_s17 + $0x1ac] sm:$0x30] }
  0x20   : > { %362 = vmatpush.bf16.msrb.mxu0 %v1278_v4  ;;  %v1578_v31 = vld [vmem:[%s1671_s17 + $0x134] sm:$0xf]  ;;  %v1390_v34 = vor.u32 %v1583_v25, %v1389_v24  ;;  %v1394_v35 = vor.u32 %v1579_v26, %v1391_v28  ;;  %v1382_v36 = vor.u32 %v1582_v30, %v1381_v29  ;;  %v1357_v41 = vld [vmem:[%s1671_s17 + $0x38] sm:$0xf]  ;;  %v1571_v43 = vld [vmem:[%s1671_s17 + $0x3c] sm:$0xf] }
  0x21   : > { %390 = vmatpush.bf16.msrb.mxu2 %v1286_v57  ;;  %v1383_v33 = vld [vmem:[%s1671_s17 + $0x1b0] sm:$0x30]  ;;  %v1575_v42 = vld [vmem:[%s1671_s17 + $0xb4] sm:$0xf0]  ;;  %v1359_v45 = vld [vmem:[%s1671_s17 + $0xb8] sm:$0xf0] }
  0x22   : > { %404 = vmatpush.bf16.msrb.mxu3 %v1290_v61  ;;  %376 = vmatpush.bf16.msrb.mxu1 %v1282_v14  ;;  %v1386_v37 = vor.u32 %v1578_v31, %v1383_v33  ;;  %v518_v38 = vand.u32 %v1390_v34, %v1673_v2  ;;  %v521_v39 = vand.u32 %v1394_v35, %v1673_v2  ;;  %v1349_v46 = vld [vmem:[%s1671_s17 + $0x30] sm:$0xf]  ;;  %v1570_v48 = vld [vmem:[%s1671_s17 + $0x34] sm:$0xf]  ;;  %v1445_v54 = vld [vmem:[%s1671_s17 + $0x148] sm:$0xf] }
  0x23   : > { %v512_v40 = vand.u32 %v1382_v36, %v1673_v2  ;;  %v1574_v47 = vld [vmem:[%s1671_s17 + $0xac] sm:$0xf0]  ;;  %v1351_v49 = vld [vmem:[%s1671_s17 + $0xb0] sm:$0xf0]  ;;  %v1358_v50 = vor.u32 %v1575_v42, %v1357_v41  ;;  %v1362_v51 = vor.u32 %v1571_v43, %v1359_v45  ;;  %v1597_v55 = vld [vmem:[%s1671_s17 + $0x1c4] sm:$0x30] }
  0x24   : > { %529 = vmatpush.bf16.msra.mxu0 %v500_v15  ;;  %v515_v44 = vand.u32 %v1386_v37, %v1673_v2  ;;  %v1350_v52 = vor.u32 %v1574_v47, %v1349_v46  ;;  %v1354_v53 = vor.u32 %v1570_v48, %v1351_v49  ;;  %v1593_v56 = vld [vmem:[%s1671_s17 + $0x14c] sm:$0xf]  ;;  %v1437_v58 = vld [vmem:[%s1671_s17 + $0x140] sm:$0xf]  ;;  %v1592_v60 = vld [vmem:[%s1671_s17 + $0x144] sm:$0xf]  ;;  %v1446_v62 = vor.u32 %v1597_v55, %v1445_v54 }
  0x25   : > { %557 = vmatpush.bf16.msra.mxu2 %v506_v9  ;;  %v1447_v57 = vld [vmem:[%s1671_s17 + $0x1c8] sm:$0x30]  ;;  %v1596_v59 = vld [vmem:[%s1671_s17 + $0x1bc] sm:$0x30]  ;;  %v1439_v61 = vld [vmem:[%s1671_s17 + $0x1c0] sm:$0x30] }
  0x26   : > { %571 = vmatpush.bf16.msra.mxu3 %v509_v10  ;;  %543 = vmatpush.bf16.msra.mxu1 %v503_v16  ;;  %v1450_v63 = vor.u32 %v1593_v56, %v1447_v57  ;;  %v1438_v0 = vor.u32 %v1596_v59, %v1437_v58  ;;  %v1442_v1 = vor.u32 %v1592_v60, %v1439_v61  ;;  %v1413_v6 = vld [vmem:[%s1671_s17 + $0x48] sm:$0xf]  ;;  %v1585_v8 = vld [vmem:[%s1671_s17 + $0x4c] sm:$0xf]  ;;  %v1405_v11 = vld [vmem:[%s1671_s17 + $0x40] sm:$0xf] }
  0x27   : > { %v746_v3 = vand.u32 %v1446_v62, %v1673_v2  ;;  %v1589_v7 = vld [vmem:[%s1671_s17 + $0xc4] sm:$0xf0]  ;;  %v1415_v10 = vld [vmem:[%s1671_s17 + $0xc8] sm:$0xf0]  ;;  %v1588_v12 = vld [vmem:[%s1671_s17 + $0xbc] sm:$0xf0] }
  0x28   : > { %530 = vmatpush.bf16.msra.mxu0 %v1334_v23  ;;  %v749_v4 = vand.u32 %v1450_v63, %v1673_v2  ;;  %v740_v5 = vand.u32 %v1438_v0, %v1673_v2  ;;  %v743_v9 = vand.u32 %v1442_v1, %v1673_v2  ;;  %v1584_v13 = vld [vmem:[%s1671_s17 + $0x44] sm:$0xf]  ;;  %v1414_v15 = vor.u32 %v1589_v7, %v1413_v6  ;;  %v1461_v19 = vld [vmem:[%s1671_s17 + $0x158] sm:$0xf]  ;;  %v1595_v21 = vld [vmem:[%s1671_s17 + $0x15c] sm:$0xf] }
  0x29   : > { %558 = vmatpush.bf16.msra.mxu2 %v1342_v17  ;;  %v1407_v14 = vld [vmem:[%s1671_s17 + $0xc0] sm:$0xf0]  ;;  %v1418_v16 = vor.u32 %v1585_v8, %v1415_v10  ;;  %v1406_v17 = vor.u32 %v1588_v12, %v1405_v11  ;;  %v1463_v22 = vld [vmem:[%s1671_s17 + $0x1d8] sm:$0x30]  ;;  %v1453_v23 = vld [vmem:[%s1671_s17 + $0x150] sm:$0xf] }
  0x2a   : > { %572 = vmatpush.bf16.msra.mxu3 %v1346_v20  ;;  %544 = vmatpush.bf16.msra.mxu1 %v1338_v27  ;;  %v1410_v18 = vor.u32 %v1584_v13, %v1407_v14  ;;  %v1599_v20 = vld [vmem:[%s1671_s17 + $0x1d4] sm:$0x30]  ;;  %v1598_v24 = vld [vmem:[%s1671_s17 + $0x1cc] sm:$0x30]  ;;  %v1594_v25 = vld [vmem:[%s1671_s17 + $0x154] sm:$0xf]  ;;  %v1466_v28 = vor.u32 %v1595_v21, %v1463_v22 }
  0x2b   : > { %1327 = vmatmul.msk.bf16.vlgmr.msrb.gmra.mxu0 %vm267_vm2, %v1700_v32  ;;  %1328 = vmatmul.msk.bf16.vlgmr.msrb.gmra.mxu1 %vm267_vm2, %v1700_v32  ;;  %v1455_v26 = vld [vmem:[%s1671_s17 + $0x1d0] sm:$0x30]  ;;  %v1462_v27 = vor.u32 %v1599_v20, %v1461_v19  ;;  %v1454_v29 = vor.u32 %v1598_v24, %v1453_v23  ;;  %v1429_v35 = vld [vmem:[%s1671_s17 + $0x58] sm:$0xf]  ;;  %v1587_v37 = vld [vmem:[%s1671_s17 + $0x5c] sm:$0xf] }
  0x2c   : > { %1329 = vmatmul.msk.bf16.vlgmr.msrb.gmra.mxu2 %vm267_vm2, %v1700_v32  ;;  %585 = vmatpush.bf16.msrb.mxu0 %v512_v40  ;;  %v1458_v30 = vor.u32 %v1594_v25, %v1455_v26  ;;  %v761_v33 = vand.u32 %v1466_v28, %v1673_v2  ;;  %v1591_v36 = vld [vmem:[%s1671_s17 + $0xd4] sm:$0xf0]  ;;  %v1421_v40 = vld [vmem:[%s1671_s17 + $0x50] sm:$0xf]  ;;  %v1586_v42 = vld [vmem:[%s1671_s17 + $0x54] sm:$0xf] }
  0x2d   : > { %1330 = vmatmul.msk.bf16.vlgmr.msrb.gmra.mxu3 %vm267_vm2, %v1700_v32  ;;  %613 = vmatpush.bf16.msrb.mxu2 %v518_v38  ;;  %v758_v31 = vand.u32 %v1462_v27, %v1673_v2  ;;  %v752_v34 = vand.u32 %v1454_v29, %v1673_v2  ;;  %v1590_v41 = vld [vmem:[%s1671_s17 + $0xcc] sm:$0xf0]  ;;  %v1423_v43 = vld [vmem:[%s1671_s17 + $0xd0] sm:$0xf0]  ;;  %v1517_v48 = vld [vmem:[%s1671_s17 + $0x168] sm:$0xf] }
  0x2e   : > { %627 = vmatpush.bf16.msrb.mxu3 %v521_v39  ;;  %599 = vmatpush.bf16.msrb.mxu1 %v515_v44  ;;  %v755_v38 = vand.u32 %v1458_v30, %v1673_v2  ;;  %v1431_v39 = vld [vmem:[%s1671_s17 + $0xd8] sm:$0xf0]  ;;  %v1430_v44 = vor.u32 %v1591_v36, %v1429_v35  ;;  %v1422_v46 = vor.u32 %v1590_v41, %v1421_v40  ;;  %v1613_v49 = vld [vmem:[%s1671_s17 + $0x1e4] sm:$0x30]  ;;  %v1608_v54 = vld [vmem:[%s1671_s17 + $0x164] sm:$0xf] }
  0x2f   : > { %v1434_v45 = vor.u32 %v1587_v37, %v1431_v39  ;;  %v1426_v47 = vor.u32 %v1586_v42, %v1423_v43  ;;  %v1511_v55 = vld [vmem:[%s1671_s17 + $0x1e0] sm:$0x30]  ;;  %v1518_v56 = vor.u32 %v1613_v49, %v1517_v48  ;;  %v1485_v63 = vld [vmem:[%s1671_s17 + $0x68] sm:$0xf]  ;;  %v1601_v1 = vld [vmem:[%s1671_s17 + $0x6c] sm:$0xf] }
  0x30   : > { %586 = vmatpush.bf16.msrb.mxu0 %v1350_v52  ;;  %v1509_v52 = vld [vmem:[%s1671_s17 + $0x160] sm:$0xf]  ;;  %v1514_v59 = vor.u32 %v1608_v54, %v1511_v55  ;;  %v1605_v0 = vld [vmem:[%s1671_s17 + $0xe4] sm:$0xf0]  ;;  %v1600_v7 = vld [vmem:[%s1671_s17 + $0x64] sm:$0xf] }
  0x31   : > { %614 = vmatpush.bf16.msrb.mxu2 %v1358_v50  ;;  %v1609_v50 = vld [vmem:[%s1671_s17 + $0x16c] sm:$0xf]  ;;  %v986_v60 = vand.u32 %v1518_v56, %v1673_v2  ;;  %v1604_v6 = vld [vmem:[%s1671_s17 + $0xdc] sm:$0xf0]  ;;  %v1479_v8 = vld [vmem:[%s1671_s17 + $0xe0] sm:$0xf0] }
  0x32   : > { %628 = vmatpush.bf16.msrb.mxu3 %v1362_v51  ;;  %600 = vmatpush.bf16.msrb.mxu1 %v1354_v53  ;;  %v1519_v51 = vld [vmem:[%s1671_s17 + $0x1e8] sm:$0x30]  ;;  %v1612_v53 = vld [vmem:[%s1671_s17 + $0x1dc] sm:$0x30]  ;;  %v1482_v12 = vor.u32 %v1600_v7, %v1479_v8  ;;  %v1533_v13 = vld [vmem:[%s1671_s17 + $0x178] sm:$0xf] }
  0x33   : > { %v1522_v57 = vor.u32 %v1609_v50, %v1519_v51  ;;  %v1510_v58 = vor.u32 %v1612_v53, %v1509_v52  ;;  %v1131_v14 = vld [vmem:[%s2039_s2] sm:$0xff]  ;;  %v1614_v19 = vld [vmem:[%s1671_s17 + $0x1ec] sm:$0x30]  ;;  %v1636_v20 = vmov 0   ;;  %v1610_v21 = vld [vmem:[%s1671_s17 + $0x174] sm:$0xf] }
  0x34   : > { %1626 = vset.pattern.permute.xlu0 %v1636_v20  ;;  %v1527_v22 = vld [vmem:[%s1671_s17 + $0x1f0] sm:$0x30]  ;;  %v1501_v30 = vld [vmem:[%s1671_s17 + $0x78] sm:$0xf]  ;;  %v1503_v35 = vld [vmem:[%s1671_s17 + $0xf8] sm:$0xf0] }
  0x35   : > { %v989_v61 = vand.u32 %v1522_v57, %v1673_v2  ;;  %v980_v62 = vand.u32 %v1510_v58, %v1673_v2  ;;  %1135 = vperm.xlu0 %1626, %v1131_v14   ;;  %v1530_v26 = vor.u32 %v1610_v21, %v1527_v22  ;;  %v1493_v36 = vld [vmem:[%s1671_s17 + $0x70] sm:$0xf]  ;;  %v1495_v39 = vld [vmem:[%s1671_s17 + $0xf0] sm:$0xf0] }
  0x36   : > { %v1606_v37 = vld [vmem:[%s1671_s17 + $0xec] sm:$0xf0] }
  0x37   : > { %v1494_v42 = vor.u32 %v1606_v37, %v1493_v36 }
  0x3b   : > { %1395 = vmatmul.msk.bf16.vlgmr.msra.gmra.mxu0 %vm267_vm2, %v1700_v32  ;;  %1396 = vmatmul.msk.bf16.vlgmr.msra.gmra.mxu1 %vm267_vm2, %v1700_v32 }
  0x3c   : > { %1397 = vmatmul.msk.bf16.vlgmr.msra.gmra.mxu2 %vm267_vm2, %v1700_v32  ;;  %769 = vmatpush.bf16.msra.mxu0 %v740_v5  ;;  %v1477_v5 = vld [vmem:[%s1671_s17 + $0x60] sm:$0xf] }
  0x3d   : > { %1398 = vmatmul.msk.bf16.vlgmr.msra.gmra.mxu3 %vm267_vm2, %v1700_v32  ;;  %797 = vmatpush.bf16.msra.mxu2 %v746_v3  ;;  %v983_v3 = vand.u32 %v1514_v59, %v1673_v2  ;;  %v1478_v11 = vor.u32 %v1604_v6, %v1477_v5 }
  0x3e   : > { %811 = vmatpush.bf16.msra.mxu3 %v749_v4  ;;  %783 = vmatpush.bf16.msra.mxu1 %v743_v9  ;;  %v1487_v4 = vld [vmem:[%s1671_s17 + $0xe8] sm:$0xf0]  ;;  %v1486_v9 = vor.u32 %v1605_v0, %v1485_v63 }
  0x3f   : > { %v1490_v10 = vor.u32 %v1601_v1, %v1487_v4 }
  0x40   : > { %770 = vmatpush.bf16.msra.mxu0 %v1406_v17  ;;  %v1535_v17 = vld [vmem:[%s1671_s17 + $0x1f8] sm:$0x30] }
  0x41   : > { %798 = vmatpush.bf16.msra.mxu2 %v1414_v15  ;;  %v1615_v15 = vld [vmem:[%s1671_s17 + $0x1f4] sm:$0x30] }
  0x42   : > { %812 = vmatpush.bf16.msra.mxu3 %v1418_v16  ;;  %784 = vmatpush.bf16.msra.mxu1 %v1410_v18  ;;  %v1611_v16 = vld [vmem:[%s1671_s17 + $0x17c] sm:$0xf]  ;;  %v1525_v18 = vld [vmem:[%s1671_s17 + $0x170] sm:$0xf]  ;;  %v1534_v23 = vor.u32 %v1615_v15, %v1533_v13 }
  0x43   : > { %v1538_v24 = vor.u32 %v1611_v16, %v1535_v17  ;;  %v1526_v25 = vor.u32 %v1614_v19, %v1525_v18 }
  0x44   : > { %v998_v27 = vand.u32 %v1534_v23, %v1673_v2 }
  0x45   : > { %v1001_v28 = vand.u32 %v1538_v24, %v1673_v2  ;;  %v992_v29 = vand.u32 %v1526_v25, %v1673_v2 }
  0x4b   : > { %1399 = vmatmul.msk.bf16.vlgmr.msrb.gmra.mxu0 %vm267_vm2, %v1700_v32  ;;  %1400 = vmatmul.msk.bf16.vlgmr.msrb.gmra.mxu1 %vm267_vm2, %v1700_v32 }
  0x4c   : > { %1401 = vmatmul.msk.bf16.vlgmr.msrb.gmra.mxu2 %vm267_vm2, %v1700_v32  ;;  %825 = vmatpush.bf16.msrb.mxu0 %v752_v34  ;;  %v995_v34 = vand.u32 %v1530_v26, %v1673_v2  ;;  %v1132_v2 = vld [vmem:[%s2039_s2 + $0x8] sm:$0xff] }
  0x4d   : > { %1402 = vmatmul.msk.bf16.vlgmr.msrb.gmra.mxu3 %vm267_vm2, %v1700_v32  ;;  %853 = vmatpush.bf16.msrb.mxu2 %v758_v31  ;;  %v1607_v31 = vld [vmem:[%s1671_s17 + $0xf4] sm:$0xf0] }
  0x4e   : > { %867 = vmatpush.bf16.msrb.mxu3 %v761_v33  ;;  %839 = vmatpush.bf16.msrb.mxu1 %v755_v38  ;;  %v1603_v33 = vld [vmem:[%s1671_s17 + $0x7c] sm:$0xf]  ;;  %v1602_v38 = vld [vmem:[%s1671_s17 + $0x74] sm:$0xf]  ;;  %v1502_v40 = vor.u32 %v1607_v31, %v1501_v30 }
  0x4f   : > { %v1506_v41 = vor.u32 %v1603_v33, %v1503_v35  ;;  %v1498_v43 = vor.u32 %v1602_v38, %v1495_v39  ;;  %1140 = vperm.xlu0 %1626, %v1132_v2  }
  0x50   : > { %826 = vmatpush.bf16.msrb.mxu0 %v1422_v46 }
  0x51   : > { %854 = vmatpush.bf16.msrb.mxu2 %v1430_v44 }
  0x52   : > { %868 = vmatpush.bf16.msrb.mxu3 %v1434_v45  ;;  %840 = vmatpush.bf16.msrb.mxu1 %v1426_v47 }
  0x5b   : > { %1467 = vmatmul.msk.bf16.vlgmr.msra.gmra.mxu0 %vm267_vm2, %v1700_v32  ;;  %1468 = vmatmul.msk.bf16.vlgmr.msra.gmra.mxu1 %vm267_vm2, %v1700_v32 }
  0x5c   : > { %1469 = vmatmul.msk.bf16.vlgmr.msra.gmra.mxu2 %vm267_vm2, %v1700_v32  ;;  %1009 = vmatpush.bf16.msra.mxu0 %v980_v62 }
  0x5d   : > { %1470 = vmatmul.msk.bf16.vlgmr.msra.gmra.mxu3 %vm267_vm2, %v1700_v32  ;;  %1037 = vmatpush.bf16.msra.mxu2 %v986_v60 }
  0x5e   : > { %1051 = vmatpush.bf16.msra.mxu3 %v989_v61  ;;  %1023 = vmatpush.bf16.msra.mxu1 %v983_v3 }
  0x60   : > { %1010 = vmatpush.bf16.msra.mxu0 %v1478_v11 }
  0x61   : > { %1038 = vmatpush.bf16.msra.mxu2 %v1486_v9 }
  0x62   : > { %1052 = vmatpush.bf16.msra.mxu3 %v1490_v10  ;;  %1024 = vmatpush.bf16.msra.mxu1 %v1482_v12 }
  0x6b   : > { %1471 = vmatmul.msk.bf16.vlgmr.msrb.gmra.mxu0 %vm267_vm2, %v1700_v32  ;;  %1472 = vmatmul.msk.bf16.vlgmr.msrb.gmra.mxu1 %vm267_vm2, %v1700_v32 }
  0x6c   : > { %1473 = vmatmul.msk.bf16.vlgmr.msrb.gmra.mxu2 %vm267_vm2, %v1700_v32  ;;  %1065 = vmatpush.bf16.msrb.mxu0 %v992_v29 }
  0x6d   : > { %1474 = vmatmul.msk.bf16.vlgmr.msrb.gmra.mxu3 %vm267_vm2, %v1700_v32  ;;  %1093 = vmatpush.bf16.msrb.mxu2 %v998_v27 }
  0x6e   : > { %1107 = vmatpush.bf16.msrb.mxu3 %v1001_v28  ;;  %1079 = vmatpush.bf16.msrb.mxu1 %v995_v34 }
  0x70   : > { %1066 = vmatpush.bf16.msrb.mxu0 %v1494_v42 }
  0x71   : > { %1094 = vmatpush.bf16.msrb.mxu2 %v1502_v40 }
  0x72   : > { %1108 = vmatpush.bf16.msrb.mxu3 %v1506_v41  ;;  %1080 = vmatpush.bf16.msrb.mxu1 %v1498_v43 }
  0x7b   : > { %1539 = vmatmul.msk.bf16.vlgmr.msra.gmra.mxu0 %vm267_vm2, %v1700_v32  ;;  %1540 = vmatmul.msk.bf16.vlgmr.msra.gmra.mxu1 %vm267_vm2, %v1700_v32 }
  0x7c   : > { %1541 = vmatmul.msk.bf16.vlgmr.msra.gmra.mxu2 %vm267_vm2, %v1700_v32 }
  0x7d   : > { %1542 = vmatmul.msk.bf16.vlgmr.msra.gmra.mxu3 %vm267_vm2, %v1700_v32 }
  0x8b   : > { %1543 = vmatmul.msk.bf16.vlgmr.msrb.gmra.mxu0 %vm267_vm2, %v1700_v32  ;;  %1544 = vmatmul.msk.bf16.vlgmr.msrb.gmra.mxu1 %vm267_vm2, %v1700_v32 }
  0x8c   : > { %1545 = vmatmul.msk.bf16.vlgmr.msrb.gmra.mxu2 %vm267_vm2, %v1700_v32 }
  0x8d   : > { %1546 = vmatmul.msk.bf16.vlgmr.msrb.gmra.mxu3 %vm267_vm2, %v1700_v32 }
  0x98   : > { %v308_v44 = vpop.f32.mrf.mxu0  ;;  %v322_v45 = vpop.f32.mrf.mxu1 }
  0x9f   : > { %v1910_v46 = vpop.f32.mrf.mxu2 }
  0xa0   : > { %v1912_v47 = vpop.f32.mrf.mxu3  ;;  %v1914_v48 = vpop.f32.mrf.mxu0 }
  0xa1   : > { %v1916_v49 = vpop.f32.mrf.mxu1 }
  0xa7   : > { %v1918_v50 = vpop.f32.mrf.mxu2  ;;  %v1966_v27 = vpop.permute.xlu0 %1135 }
  0xa8   : > { %v1920_v51 = vpop.f32.mrf.mxu3  ;;  %v1922_v52 = vpop.f32.mrf.mxu0 }
  0xa9   : > { %v1924_v53 = vpop.f32.mrf.mxu1 }
  0xaf   : > { %v1926_v54 = vpop.f32.mrf.mxu2 }
  0xb0   : > { %v1928_v32 = vpop.f32.mrf.mxu3  ;;  %v1930_v55 = vpop.f32.mrf.mxu0 }
  0xb1   : > { %v1932_v56 = vpop.f32.mrf.mxu1 }
  0xb7   : > { %v1934_v57 = vpop.f32.mrf.mxu2 }
  0xb8   : > { %v1936_v58 = vpop.f32.mrf.mxu3  ;;  %v532_v59 = vpop.f32.mrf.mxu0 }
  0xb9   : > { %v546_v60 = vpop.f32.mrf.mxu1  ;;  %v635_v26 = vmax.f32 %v308_v44, %v532_v59 }
  0xba   : > { %v636_v28 = vmax.f32 %v322_v45, %v546_v60 }
  0xbf   : > { %v560_v61 = vpop.f32.mrf.mxu2 }
  0xc0   : > { %v574_v62 = vpop.f32.mrf.mxu3  ;;  %v534_v63 = vpop.f32.mrf.mxu0  ;;  %v637_v39 = vmax.f32 %v1910_v46, %v560_v61 }
  0xc1   : > { %v548_v0 = vpop.f32.mrf.mxu1  ;;  %v638_v2 = vmax.f32 %v1912_v47, %v574_v62  ;;  %v643_v41 = vmax.f32 %v1914_v48, %v534_v63  ;;  %v1984_v46 = vpop.permute.xlu0 %1140 }
  0xc2   : > { %v644_v43 = vmax.f32 %v1916_v49, %v548_v0 }
  0xc7   : > { %v1938_v1 = vpop.f32.mrf.mxu2 }
  0xc8   : > { %v1940_v3 = vpop.f32.mrf.mxu3  ;;  %v1942_v4 = vpop.f32.mrf.mxu0 }
  0xc9   : > { %v1944_v5 = vpop.f32.mrf.mxu1 }
  0xcf   : > { %v1946_v6 = vpop.f32.mrf.mxu2 }
  0xd0   : > { %v1948_v7 = vpop.f32.mrf.mxu3  ;;  %v1950_v8 = vpop.f32.mrf.mxu0 }
  0xd1   : > { %v1952_v9 = vpop.f32.mrf.mxu1 }
  0xd7   : > { %v1954_v10 = vpop.f32.mrf.mxu2 }
  0xd8   : > { %v1956_v11 = vpop.f32.mrf.mxu3  ;;  %v772_v12 = vpop.f32.mrf.mxu0 }
  0xd9   : > { %v786_v13 = vpop.f32.mrf.mxu1  ;;  %v875_v29 = vmax.f32 %v635_v26, %v772_v12 }
  0xda   : > { %v876_v31 = vmax.f32 %v636_v28, %v786_v13  ;;  %v645_v28 = vmax.f32 %v1918_v50, %v1938_v1 }
  0xdf   : > { %v800_v14 = vpop.f32.mrf.mxu2 }
  0xe0   : > { %v814_v15 = vpop.f32.mrf.mxu3  ;;  %v774_v16 = vpop.f32.mrf.mxu0  ;;  %v877_v44 = vmax.f32 %v637_v39, %v800_v14 }
  0xe1   : > { %v788_v17 = vpop.f32.mrf.mxu1  ;;  %v878_v59 = vmax.f32 %v638_v2, %v814_v15  ;;  %v883_v60 = vmax.f32 %v643_v41, %v774_v16 }
  0xe2   : > { %v884_v61 = vmax.f32 %v644_v43, %v788_v17 }
  0xe7   : > { %v802_v18 = vpop.f32.mrf.mxu2 }
  0xe8   : > { %v816_v19 = vpop.f32.mrf.mxu3  ;;  %v828_v20 = vpop.f32.mrf.mxu0 }
  0xe9   : > { %v842_v21 = vpop.f32.mrf.mxu1 }
  0xef   : > { %v1958_v22 = vpop.f32.mrf.mxu2 }
  0xf0   : > { %v1960_v23 = vpop.f32.mrf.mxu3  ;;  %v1962_v24 = vpop.f32.mrf.mxu0 }
  0xf1   : > { %v1964_v25 = vpop.f32.mrf.mxu1 }
  0xf7   : > { %v1968_v30 = vpop.f32.mrf.mxu2 }
  0xf8   : > { %v1970_v33 = vpop.f32.mrf.mxu3  ;;  %v1012_v34 = vpop.f32.mrf.mxu0 }
  0xf9   : > { %v1115_v35 = vmax.f32 %v875_v29, %v1012_v34  ;;  %v1026_v36 = vpop.f32.mrf.mxu1  ;;  %v639_v34 = vmax.f32 %v1922_v52, %v1942_v4 }
  0xfa   : > { %v1116_v37 = vmax.f32 %v876_v31, %v1026_v36  ;;  %v646_v31 = vmax.f32 %v1920_v51, %v1940_v3 }
  0xfb   : > { %v1143_v38 = vadd.f32 %v1966_v27, %v1115_v35  ;;  %v879_v50 = vmax.f32 %v639_v34, %v828_v20 }
  0xfc   : > { %v1144_v40 = vadd.f32 %v1966_v27, %v1116_v37  ;;  %v640_v37 = vmax.f32 %v1924_v53, %v1944_v5 }
  0xfd   : > { %v1159_v42 = vmax.f32 %v1143_v38, 0.0  ;;  %v885_v38 = vmax.f32 %v645_v28, %v802_v18 }
  0xfe   : > { %v1160_v45 = vmax.f32 %v1144_v40, 0.0  ;;  %v886_v40 = vmax.f32 %v646_v31, %v816_v19  ;;  %v880_v41 = vmax.f32 %v640_v37, %v842_v21  ;;  %v641_v19 = vmax.f32 %v1926_v54, %v1946_v6 }
  0xff   : > { %v1040_v12 = vpop.f32.mrf.mxu2 }
 0x100   : > { %v1175_v47 = vpack.c.bf16 %v1160_v45, %v1159_v42  ;;  %v1117_v62 = vmax.f32 %v877_v44, %v1040_v12  ;;  %v1054_v48 = vpop.f32.mrf.mxu3  ;;  %v1014_v63 = vpop.f32.mrf.mxu0 }
 0x101   : > { %v1118_v13 = vmax.f32 %v878_v59, %v1054_v48  ;;  %v1123_v49 = vmax.f32 %v883_v60, %v1014_v63  ;;  %v1028_v0 = vpop.f32.mrf.mxu1  ;;  %v642_v59 = vmax.f32 %v1928_v32, %v1948_v7  ;;  %v647_v60 = vmax.f32 %v1930_v55, %v1950_v8 }
 0x102   : > { %v1145_v14 = vadd.f32 %v1966_v27, %v1117_v62  ;;  %1183 = vst [vmem:[%s1982_s27] sm:$0xff] %v1175_v47  ;;  %v1124_v15 = vmax.f32 %v884_v61, %v1028_v0  ;;  %v648_v47 = vmax.f32 %v1932_v56, %v1952_v9  ;;  %v881_v62 = vmax.f32 %v641_v19, %v1958_v22 }
 0x103   : > { %v1146_v16 = vadd.f32 %v1966_v27, %v1118_v13  ;;  %v1151_v26 = vadd.f32 %v1984_v46, %v1123_v49  ;;  %v882_v54 = vmax.f32 %v642_v59, %v1960_v23  ;;  %v887_v6 = vmax.f32 %v647_v60, %v1962_v24 }
 0x104   : > { %v1161_v29 = vmax.f32 %v1145_v14, 0.0  ;;  %v1152_v17 = vadd.f32 %v1984_v46, %v1124_v15  ;;  %v888_v32 = vmax.f32 %v648_v47, %v1964_v25  ;;  %v649_v25 = vmax.f32 %v1934_v57, %v1954_v10 }
 0x105   : > { %v1162_v35 = vmax.f32 %v1146_v16, 0.0  ;;  %v1167_v36 = vmax.f32 %v1151_v26, 0.0  ;;  %v650_v26 = vmax.f32 %v1936_v58, %v1956_v11 }
 0x106   : > { %v1168_v39 = vmax.f32 %v1152_v17, 0.0  ;;  %v889_v17 = vmax.f32 %v649_v25, %v1968_v30 }
 0x107   : > { %v1176_v1 = vpack.c.bf16 %v1162_v35, %v1161_v29  ;;  %v1042_v2 = vpop.f32.mrf.mxu2 }
 0x108   : > { %v1179_v42 = vpack.c.bf16 %v1168_v39, %v1167_v36  ;;  %v1125_v43 = vmax.f32 %v885_v38, %v1042_v2  ;;  %v1056_v51 = vpop.f32.mrf.mxu3  ;;  %v1068_v3 = vpop.f32.mrf.mxu0 }
 0x109   : > { %1184 = vst [vmem:[%s1982_s27 + $0x8] sm:$0xff] %v1176_v1  ;;  %v1126_v44 = vmax.f32 %v886_v40, %v1056_v51  ;;  %v1119_v52 = vmax.f32 %v879_v50, %v1068_v3  ;;  %v1082_v4 = vpop.f32.mrf.mxu1 }
 0x10a   : > { %1187 = vst [vmem:[%s1982_s27 + $0x20] sm:$0xff] %v1179_v42  ;;  %v1153_v45 = vadd.f32 %v1984_v46, %v1125_v43  ;;  %v1120_v53 = vmax.f32 %v880_v41, %v1082_v4 }
 0x10b   : > { %v1154_v5 = vadd.f32 %v1984_v46, %v1126_v44  ;;  %v1147_v18 = vadd.f32 %v1966_v27, %v1119_v52 }
 0x10c   : > { %v1169_v20 = vmax.f32 %v1153_v45, 0.0  ;;  %v1148_v21 = vadd.f32 %v1966_v27, %v1120_v53 }
 0x10d   : > { %v1170_v12 = vmax.f32 %v1154_v5, 0.0  ;;  %v1163_v61 = vmax.f32 %v1147_v18, 0.0 }
 0x10e   : > { %v1164_v48 = vmax.f32 %v1148_v21, 0.0 }
 0x10f   : > { %v1180_v63 = vpack.c.bf16 %v1170_v12, %v1169_v20  ;;  %v1096_v13 = vpop.f32.mrf.mxu2 }
 0x110   : > { %v1177_v7 = vpack.c.bf16 %v1164_v48, %v1163_v61  ;;  %v1121_v49 = vmax.f32 %v881_v62, %v1096_v13  ;;  %v1110_v55 = vpop.f32.mrf.mxu3  ;;  %v1070_v8 = vpop.f32.mrf.mxu0 }
 0x111   : > { %1188 = vst [vmem:[%s1982_s27 + $0x28] sm:$0xff] %v1180_v63  ;;  %v1122_v0 = vmax.f32 %v882_v54, %v1110_v55  ;;  %v1127_v14 = vmax.f32 %v887_v6, %v1070_v8  ;;  %v1084_v56 = vpop.f32.mrf.mxu1 }
 0x112   : > { %1185 = vst [vmem:[%s1982_s27 + $0x10] sm:$0xff] %v1177_v7  ;;  %v1149_v9 = vadd.f32 %v1966_v27, %v1121_v49  ;;  %v1128_v22 = vmax.f32 %v888_v32, %v1084_v56 }
 0x113   : > { %v1150_v23 = vadd.f32 %v1966_v27, %v1122_v0  ;;  %v1155_v24 = vadd.f32 %v1984_v46, %v1127_v14  ;;  %v890_v27 = vmax.f32 %v650_v26, %v1970_v33 }
 0x114   : > { %v1165_v15 = vmax.f32 %v1149_v9, 0.0  ;;  %v1156_v16 = vadd.f32 %v1984_v46, %v1128_v22 }
 0x115   : > { %v1166_v28 = vmax.f32 %v1150_v23, 0.0  ;;  %v1171_v29 = vmax.f32 %v1155_v24, 0.0 }
 0x116   : > { %v1172_v31 = vmax.f32 %v1156_v16, 0.0 }
 0x117   : > { %v1178_v34 = vpack.c.bf16 %v1166_v28, %v1165_v15  ;;  %v1098_v35 = vpop.f32.mrf.mxu2 }
 0x118   : > { %v1181_v36 = vpack.c.bf16 %v1172_v31, %v1171_v29  ;;  %v1129_v37 = vmax.f32 %v889_v17, %v1098_v35  ;;  %v1112_v57 = vpop.f32.mrf.mxu3 }
 0x119   : > { %1186 = vst [vmem:[%s1982_s27 + $0x18] sm:$0xff] %v1178_v34  ;;  %v1130_v10 = vmax.f32 %v890_v27, %v1112_v57 }
 0x11a   : > { %1189 = vst [vmem:[%s1982_s27 + $0x30] sm:$0xff] %v1181_v36  ;;  %v1157_v38 = vadd.f32 %v1984_v46, %v1129_v37 }
 0x11b   : > { %v1158_v58 = vadd.f32 %v1984_v46, %v1130_v10 }
 0x11c   : > { %v1173_v11 = vmax.f32 %v1157_v38, 0.0 }
 0x11d   : > { %v1174_v39 = vmax.f32 %v1158_v58, 0.0 }
 0x11f   : > { %v1182_v40 = vpack.c.bf16 %v1174_v39, %v1173_v11 }
 0x121   : > { %1190 = vst [vmem:[%s1982_s27 + $0x38] sm:$0xff] %v1182_v40 }
 0x122 PF: > { %s13_s12 = sadd.s32 1, %s1633_s12  }
 0x123   : > { %p10_p4 = scmp.ge.s32.totalorder %s13_s12, 4  }
 0x125   :  { %12 = sbr.rel (!%p10_p4) target bundleno = 1 (0x1), region = 62 }

// kernel: multimodal_classifier_forward.4
= control target key start
LH: loop header
LB: loop body
LE: loop exit
PB: predicated region body
PF: predicated region fallthrough
CT: control target
= control target key end

     0   :  { %s1521_s12 = smov 0   ;;  %s1837_s0 = inlined_call_operand.vmem [shape: bf16[2,144,1024], index: 0, kind: input, shape index: {}]   ;;  %s1838_s1 = inlined_call_operand.vmem [shape: bf16[32,144], index: 1, kind: input, shape index: {}]   ;;  %s1839_s2 = inlined_call_operand.vmem [shape: f32[32,1], index: 2, kind: input, shape index: {}]   ;;  %s1840_s3 = inlined_call_operand.vmem [shape: bf16[2,32,256], index: 3, kind: output, shape index: {}]  }
   0x1 LB: > { %s1064_s13 = sadd.s32 4294967295, %s1498_s12   ;;  %p1068_p0 = scmp.ge.s32.totalorder %s1498_s12, 1  ;;  %s1498_s12 = sphi %s1521_s12, %s13_s12  }
   0x2   : > { %p137_p1 = scmp.lt.s32.totalorder %s1498_s12, 3 }
   0x4   : > { %p138_p2 = pnand %p1068_p0, %p137_p1 }
   0x5   : > { %p161_p3 = scmp.lt.s32.totalorder (!%p138_p2), %s1064_s13, 1 }
   0x6   : > { %141 = sbr.rel (%p138_p2) target bundleno = 303 (0x12f), region = 32 }
   0xb   : > { %s1842_s13 = smov (!%p161_p3, %s1064_s13), 1  ;;  %v1395_v0 = vld [vmem:[%s1838_s1 + $0x4] sm:$0xf]  ;;  %v1076_v1 = vld [vmem:[%s1838_s1 + $0x8] sm:$0xf0]  ;;  %vm302_vm0 = vcmask 130048  }
   0xc   : > { %s1480_s14 = smul.u32 576, %s1842_s13  ;;  %v1552_v15 = vor.u32 %v1395_v0, %v1076_v1  ;;  %v1397_v52 = vld [vmem:[%s1838_s1 + $0x14] sm:$0xf]  ;;  %v1084_v54 = vld [vmem:[%s1838_s1 + $0x18] sm:$0xf0] }
   0xd   : > { %v1595_v62 = vor.u32 %v1397_v52, %v1084_v54 }
   0xe   : > { %s1535_s17 = scalar_lea.vmem %s1837_s0, %s1480_s14 }
   0xf   : > { %v1146_v2 = vld [vmem:[%s1535_s17 + $0x1c0] sm:$0xf]  ;;  %v1413_v7 = vld [vmem:[%s1535_s17 + $0x1c4] sm:$0xf]  ;;  %v1230_v13 = vld [vmem:[%s1535_s17 + $0x208] sm:$0xf] }
  0x10   : > { %v1414_v3 = vld [vmem:[%s1535_s17 + $0x1dc] sm:$0xf0]  ;;  %v1148_v8 = vld [vmem:[%s1535_s17 + $0x1e0] sm:$0xf0]  ;;  %v1434_v16 = vld [vmem:[%s1535_s17 + $0x224] sm:$0xf0] }
  0x11   : > { %v1154_v4 = vld [vmem:[%s1535_s17 + $0x200] sm:$0xf]  ;;  %v1147_v5 = vor.u32 %v1414_v3, %v1146_v2  ;;  %v1151_v10 = vor.u32 %v1413_v7, %v1148_v8  ;;  %v1415_v11 = vld [vmem:[%s1535_s17 + $0x204] sm:$0xf]  ;;  %v1231_v19 = vor.u32 %v1434_v16, %v1230_v13  ;;  %v1222_v23 = vld [vmem:[%s1535_s17 + $0x1c8] sm:$0xf] }
  0x12   : > { %v1416_v6 = vld [vmem:[%s1535_s17 + $0x21c] sm:$0xf0]  ;;  %v1156_v12 = vld [vmem:[%s1535_s17 + $0x220] sm:$0xf0]  ;;  %v1432_v25 = vld [vmem:[%s1535_s17 + $0x1e4] sm:$0xf0] }
  0x13   : > { %v1155_v9 = vor.u32 %v1416_v6, %v1154_v4  ;;  %309 = vmatpush.bf16.msra.mxu0 %v1147_v5  ;;  %v1159_v14 = vor.u32 %v1415_v11, %v1156_v12  ;;  %v1138_v17 = vld [vmem:[%s1535_s17 + $0x180] sm:$0xf]  ;;  %347 = vmatpush.bf16.msra.mxu2 %v1151_v10  ;;  %v1411_v21 = vld [vmem:[%s1535_s17 + $0x184] sm:$0xf]  ;;  %v1223_v28 = vor.u32 %v1432_v25, %v1222_v23  ;;  %v1214_v31 = vld [vmem:[%s1535_s17 + $0x188] sm:$0xf] }
  0x14   : > { %v1412_v18 = vld [vmem:[%s1535_s17 + $0x19c] sm:$0xf0]  ;;  %v1140_v22 = vld [vmem:[%s1535_s17 + $0x1a0] sm:$0xf0]  ;;  %v1430_v33 = vld [vmem:[%s1535_s17 + $0x1a4] sm:$0xf0] }
  0x15   : > { %335 = vmatpush.bf16.msra.mxu1 %v1155_v9  ;;  %v1139_v20 = vor.u32 %v1412_v18, %v1138_v17  ;;  %373 = vmatpush.bf16.msra.mxu3 %v1159_v14  ;;  %v1143_v24 = vor.u32 %v1411_v21, %v1140_v22  ;;  %v1130_v26 = vld [vmem:[%s1535_s17 + $0x140] sm:$0xf]  ;;  %v1409_v29 = vld [vmem:[%s1535_s17 + $0x144] sm:$0xf]  ;;  %v1215_v37 = vor.u32 %v1430_v33, %v1214_v31  ;;  %v1206_v40 = vld [vmem:[%s1535_s17 + $0x148] sm:$0xf] }
  0x16   : > { %v1410_v27 = vld [vmem:[%s1535_s17 + $0x15c] sm:$0xf0]  ;;  %v1132_v30 = vld [vmem:[%s1535_s17 + $0x160] sm:$0xf0]  ;;  %v1428_v41 = vld [vmem:[%s1535_s17 + $0x164] sm:$0xf0] }
  0x17   : > { %310 = vmatpush.bf16.msra.mxu0 %v1139_v20  ;;  %v1131_v32 = vor.u32 %v1410_v27, %v1130_v26  ;;  %348 = vmatpush.bf16.msra.mxu2 %v1143_v24  ;;  %v1135_v34 = vor.u32 %v1409_v29, %v1132_v30  ;;  %v1122_v35 = vld [vmem:[%s1535_s17 + $0x100] sm:$0xf]  ;;  %v1407_v38 = vld [vmem:[%s1535_s17 + $0x104] sm:$0xf]  ;;  %v1207_v46 = vor.u32 %v1428_v41, %v1206_v40  ;;  %v1198_v49 = vld [vmem:[%s1535_s17 + $0x108] sm:$0xf] }
  0x18   : > { %1160 = vmatmul.msk.bf16.vlgmr.msra.gmra.mxu1 %vm302_vm0, %v1552_v15  ;;  %1162 = vmatmul.msk.bf16.vlgmr.msra.gmra.mxu3 %vm302_vm0, %v1552_v15  ;;  %v1408_v36 = vld [vmem:[%s1535_s17 + $0x11c] sm:$0xf0]  ;;  %v1124_v39 = vld [vmem:[%s1535_s17 + $0x120] sm:$0xf0]  ;;  %v1426_v50 = vld [vmem:[%s1535_s17 + $0x124] sm:$0xf0] }
  0x19   : > { %519 = vmatpush.bf16.msrb.mxu3 %v1231_v19  ;;  %493 = vmatpush.bf16.msrb.mxu1 %v1223_v28  ;;  %v1123_v42 = vor.u32 %v1408_v36, %v1122_v35  ;;  %v1127_v43 = vor.u32 %v1407_v38, %v1124_v39  ;;  %v1114_v44 = vld [vmem:[%s1535_s17 + $0xc0] sm:$0xf]  ;;  %v1405_v47 = vld [vmem:[%s1535_s17 + $0xc4] sm:$0xf]  ;;  %v1199_v57 = vor.u32 %v1426_v50, %v1198_v49  ;;  %v1190_v60 = vld [vmem:[%s1535_s17 + $0xc8] sm:$0xf] }
  0x1a   : > { %v1406_v45 = vld [vmem:[%s1535_s17 + $0xdc] sm:$0xf0]  ;;  %v1116_v48 = vld [vmem:[%s1535_s17 + $0xe0] sm:$0xf0]  ;;  %v1424_v61 = vld [vmem:[%s1535_s17 + $0xe4] sm:$0xf0] }
  0x1b   : > { %311 = vmatpush.bf16.msra.mxu0 %v1131_v32  ;;  %349 = vmatpush.bf16.msra.mxu2 %v1135_v34  ;;  %v1115_v51 = vor.u32 %v1406_v45, %v1114_v44  ;;  %v1119_v53 = vor.u32 %v1405_v47, %v1116_v48  ;;  %v1106_v55 = vld [vmem:[%s1535_s17 + $0x80] sm:$0xf]  ;;  %v1403_v58 = vld [vmem:[%s1535_s17 + $0x84] sm:$0xf]  ;;  %v1433_v0 = vld [vmem:[%s1535_s17 + $0x20c] sm:$0xf]  ;;  %v1191_v6 = vor.u32 %v1424_v61, %v1190_v60 }
  0x1c   : > { %v1404_v56 = vld [vmem:[%s1535_s17 + $0x9c] sm:$0xf0]  ;;  %v1108_v59 = vld [vmem:[%s1535_s17 + $0xa0] sm:$0xf0]  ;;  %v1232_v1 = vld [vmem:[%s1535_s17 + $0x228] sm:$0xf0] }
  0x1d   : > { %494 = vmatpush.bf16.msrb.mxu1 %v1215_v37  ;;  %v1107_v63 = vor.u32 %v1404_v56, %v1106_v55  ;;  %v1111_v2 = vor.u32 %v1403_v58, %v1108_v59  ;;  %v1098_v3 = vld [vmem:[%s1535_s17 + $0x40] sm:$0xf]  ;;  %v1235_v5 = vor.u32 %v1433_v0, %v1232_v1  ;;  %v1401_v7 = vld [vmem:[%s1535_s17 + $0x44] sm:$0xf]  ;;  %v1182_v9 = vld [vmem:[%s1535_s17 + $0x88] sm:$0xf] }
  0x1e   : > { %v1402_v4 = vld [vmem:[%s1535_s17 + $0x5c] sm:$0xf0]  ;;  %v1100_v8 = vld [vmem:[%s1535_s17 + $0x60] sm:$0xf0]  ;;  %v1422_v10 = vld [vmem:[%s1535_s17 + $0xa4] sm:$0xf0] }
  0x1f   : > { %312 = vmatpush.bf16.msra.mxu0 %v1123_v42  ;;  %350 = vmatpush.bf16.msra.mxu2 %v1127_v43  ;;  %v1099_v11 = vor.u32 %v1402_v4, %v1098_v3  ;;  %v1103_v12 = vor.u32 %v1401_v7, %v1100_v8  ;;  %v1090_v13 = vld [vmem:[%s1535_s17] sm:$0xf]  ;;  %v1399_v16 = vld [vmem:[%s1535_s17 + $0x4] sm:$0xf]  ;;  %v1183_v17 = vor.u32 %v1422_v10, %v1182_v9  ;;  %v1431_v19 = vld [vmem:[%s1535_s17 + $0x1cc] sm:$0xf] }
  0x20   : > { %1471 = vmatpush.bf16.msra.mxu3 %v1235_v5  ;;  %v1400_v14 = vld [vmem:[%s1535_s17 + $0x1c] sm:$0xf0]  ;;  %v1092_v18 = vld [vmem:[%s1535_s17 + $0x20] sm:$0xf0]  ;;  %v1224_v20 = vld [vmem:[%s1535_s17 + $0x1e8] sm:$0xf0] }
  0x21   : > { %495 = vmatpush.bf16.msrb.mxu1 %v1207_v46  ;;  %v1174_v21 = vld [vmem:[%s1535_s17 + $0x48] sm:$0xf]  ;;  %v1091_v23 = vor.u32 %v1400_v14, %v1090_v13  ;;  %v1074_v24 = vld [vmem:[%s1838_s1] sm:$0xf]  ;;  %v1095_v26 = vor.u32 %v1399_v16, %v1092_v18  ;;  %v1227_v27 = vor.u32 %v1431_v19, %v1224_v20  ;;  %v1429_v29 = vld [vmem:[%s1535_s17 + $0x18c] sm:$0xf] }
  0x22   : > { %v1420_v22 = vld [vmem:[%s1535_s17 + $0x64] sm:$0xf0]  ;;  %v1216_v30 = vld [vmem:[%s1535_s17 + $0x1a8] sm:$0xf0]  ;;  %v1298_v34 = vld [vmem:[%s1535_s17 + $0x1d0] sm:$0xf] }
  0x23   : > { %313 = vmatpush.bf16.msra.mxu0 %v1115_v51  ;;  %351 = vmatpush.bf16.msra.mxu2 %v1119_v53  ;;  %v1396_v25 = vld [vmem:[%s1838_s1 + $0x4] sm:$0xf0]  ;;  %v1175_v28 = vor.u32 %v1420_v22, %v1174_v21  ;;  %v1450_v35 = vld [vmem:[%s1535_s17 + $0x1ec] sm:$0xf0]  ;;  %v1219_v36 = vor.u32 %v1429_v29, %v1216_v30  ;;  %v1427_v39 = vld [vmem:[%s1535_s17 + $0x14c] sm:$0xf] }
  0x24   : > { %v1625_v31 = vor.u32 %v1396_v25, %v1074_v24  ;;  %v1166_v32 = vld [vmem:[%s1535_s17 + $0x8] sm:$0xf]  ;;  %v1299_v38 = vor.u32 %v1450_v35, %v1298_v34  ;;  %v1208_v40 = vld [vmem:[%s1535_s17 + $0x168] sm:$0xf0]  ;;  %v1290_v41 = vld [vmem:[%s1535_s17 + $0x190] sm:$0xf] }
  0x25   : > { %496 = vmatpush.bf16.msrb.mxu1 %v1199_v57  ;;  %v1418_v33 = vld [vmem:[%s1535_s17 + $0x24] sm:$0xf0]  ;;  %v1448_v42 = vld [vmem:[%s1535_s17 + $0x1ac] sm:$0xf0]  ;;  %v1211_v43 = vor.u32 %v1427_v39, %v1208_v40  ;;  %v1425_v45 = vld [vmem:[%s1535_s17 + $0x10c] sm:$0xf] }
  0x26   : > { %v1167_v37 = vor.u32 %v1418_v33, %v1166_v32  ;;  %v1291_v44 = vor.u32 %v1448_v42, %v1290_v41  ;;  %v1200_v46 = vld [vmem:[%s1535_s17 + $0x128] sm:$0xf0]  ;;  %v1282_v47 = vld [vmem:[%s1535_s17 + $0x150] sm:$0xf]  ;;  %v1451_v51 = vld [vmem:[%s1535_s17 + $0x214] sm:$0xf] }
  0x27   : > { %314 = vmatpush.bf16.msra.mxu0 %v1107_v63  ;;  %352 = vmatpush.bf16.msra.mxu2 %v1111_v2  ;;  %v1446_v48 = vld [vmem:[%s1535_s17 + $0x16c] sm:$0xf0]  ;;  %v1203_v52 = vor.u32 %v1425_v45, %v1200_v46  ;;  %v1308_v54 = vld [vmem:[%s1535_s17 + $0x230] sm:$0xf0]  ;;  %v1423_v57 = vld [vmem:[%s1535_s17 + $0xcc] sm:$0xf] }
  0x28   : > { %1161 = vmatmul.msk.bf16.gmra.mxu1 %vm302_vm0, %v1595_v62  ;;  %1163 = vmatmul.msk.bf16.gmra.mxu3 %vm302_vm0, %v1595_v62  ;;  %v1306_v49 = vld [vmem:[%s1535_s17 + $0x210] sm:$0xf]  ;;  %v1283_v55 = vor.u32 %v1446_v48, %v1282_v47  ;;  %v1192_v58 = vld [vmem:[%s1535_s17 + $0xe8] sm:$0xf0]  ;;  %v1311_v59 = vor.u32 %v1451_v51, %v1308_v54  ;;  %v1398_v60 = vld [vmem:[%s1838_s1 + $0x14] sm:$0xf0] }
  0x29   : > { %497 = vmatpush.bf16.msrb.mxu1 %v1191_v6  ;;  %v1452_v50 = vld [vmem:[%s1535_s17 + $0x22c] sm:$0xf0]  ;;  %v1195_v0 = vor.u32 %v1423_v57, %v1192_v58  ;;  %v1421_v3 = vld [vmem:[%s1535_s17 + $0x8c] sm:$0xf]  ;;  %v1449_v20 = vld [vmem:[%s1535_s17 + $0x1d4] sm:$0xf] }
  0x2a   : > { %v1307_v53 = vor.u32 %v1452_v50, %v1306_v49  ;;  %v1082_v56 = vld [vmem:[%s1838_s1 + $0x10] sm:$0xf]  ;;  %v1184_v4 = vld [vmem:[%s1535_s17 + $0xa8] sm:$0xf0]  ;;  %v1300_v21 = vld [vmem:[%s1535_s17 + $0x1f0] sm:$0xf0] }
  0x2b   : > { %315 = vmatpush.bf16.msra.mxu0 %v1099_v11  ;;  %353 = vmatpush.bf16.msra.mxu2 %v1103_v12  ;;  %v1274_v61 = vld [vmem:[%s1535_s17 + $0x110] sm:$0xf]  ;;  %v1658_v1 = vor.u32 %v1398_v60, %v1082_v56  ;;  %v1187_v7 = vor.u32 %v1421_v3, %v1184_v4  ;;  %v1419_v9 = vld [vmem:[%s1535_s17 + $0x4c] sm:$0xf]  ;;  %v1303_v24 = vor.u32 %v1449_v20, %v1300_v21  ;;  %v1374_v29 = vld [vmem:[%s1535_s17 + $0x1d8] sm:$0xf] }
  0x2c   : > { %v1444_v63 = vld [vmem:[%s1535_s17 + $0x12c] sm:$0xf0]  ;;  %v1176_v10 = vld [vmem:[%s1535_s17 + $0x68] sm:$0xf0]  ;;  %v1468_v30 = vld [vmem:[%s1535_s17 + $0x1f4] sm:$0xf0] }
  0x2d   : > { %498 = vmatpush.bf16.msrb.mxu1 %v1183_v17  ;;  %v1275_v2 = vor.u32 %v1444_v63, %v1274_v61  ;;  %v1442_v6 = vld [vmem:[%s1535_s17 + $0xec] sm:$0xf0]  ;;  %v1179_v13 = vor.u32 %v1419_v9, %v1176_v10  ;;  %v1417_v16 = vld [vmem:[%s1535_s17 + $0xc] sm:$0xf]  ;;  %v1469_v32 = vld [vmem:[%s1535_s17 + $0x21c] sm:$0xf] }
  0x2e   : > { %v1258_v11 = vld [vmem:[%s1535_s17 + $0x90] sm:$0xf]  ;;  %v1168_v17 = vld [vmem:[%s1535_s17 + $0x28] sm:$0xf0]  ;;  %v1384_v33 = vld [vmem:[%s1535_s17 + $0x238] sm:$0xf0] }
  0x2f   : > { %316 = vmatpush.bf16.msra.mxu0 %v1091_v23  ;;  %354 = vmatpush.bf16.msra.mxu2 %v1095_v26  ;;  %v1440_v12 = vld [vmem:[%s1535_s17 + $0xac] sm:$0xf0]  ;;  %v1171_v22 = vor.u32 %v1417_v16, %v1168_v17  ;;  %v1387_v39 = vor.u32 %v1469_v32, %v1384_v33  ;;  %v1366_v40 = vld [vmem:[%s1535_s17 + $0x198] sm:$0xf]  ;;  %v1443_v45 = vld [vmem:[%s1535_s17 + $0x114] sm:$0xf] }
  0x30   : > { %v1259_v14 = vor.u32 %v1440_v12, %v1258_v11  ;;  %v1250_v18 = vld [vmem:[%s1535_s17 + $0x50] sm:$0xf]  ;;  %v1466_v41 = vld [vmem:[%s1535_s17 + $0x1b4] sm:$0xf0]  ;;  %v1276_v46 = vld [vmem:[%s1535_s17 + $0x130] sm:$0xf0] }
  0x31   : > { %499 = vmatpush.bf16.msrb.mxu1 %v1175_v28  ;;  %v1438_v19 = vld [vmem:[%s1535_s17 + $0x6c] sm:$0xf0]  ;;  %v1292_v28 = vld [vmem:[%s1535_s17 + $0x1b0] sm:$0xf0]  ;;  %v1382_v42 = vld [vmem:[%s1535_s17 + $0x218] sm:$0xf]  ;;  %v1367_v47 = vor.u32 %v1466_v41, %v1366_v40  ;;  %v1279_v51 = vor.u32 %v1443_v45, %v1276_v46 }
  0x32   : > { %317 = vmatmul.bf16.vlgmr.msra.gmra.mxu0 %v1625_v31  ;;  %355 = vmatmul.bf16.vlgmr.msra.gmra.mxu2 %v1625_v31  ;;  %v1251_v23 = vor.u32 %v1438_v19, %v1250_v18  ;;  %v1242_v25 = vld [vmem:[%s1535_s17 + $0x10] sm:$0xf]  ;;  %v1358_v49 = vld [vmem:[%s1535_s17 + $0x158] sm:$0xf]  ;;  %v1439_v58 = vld [vmem:[%s1535_s17 + $0x94] sm:$0xf] }
  0x33   : > { %531 = vmatpush.bf16.msrb.mxu0 %v1227_v27  ;;  %557 = vmatpush.bf16.msrb.mxu2 %v1235_v5  ;;  %v1266_v5 = vld [vmem:[%s1535_s17 + $0xd0] sm:$0xf]  ;;  %v1447_v27 = vld [vmem:[%s1535_s17 + $0x194] sm:$0xf]  ;;  %v1464_v50 = vld [vmem:[%s1535_s17 + $0x174] sm:$0xf0] }
  0x34   : > { %v1267_v8 = vor.u32 %v1442_v6, %v1266_v5  ;;  %v1436_v26 = vld [vmem:[%s1535_s17 + $0x2c] sm:$0xf0]  ;;  %v1295_v35 = vor.u32 %v1447_v27, %v1292_v28  ;;  %v1359_v54 = vor.u32 %v1464_v50, %v1358_v49  ;;  %v1462_v56 = vld [vmem:[%s1535_s17 + $0x134] sm:$0xf0]  ;;  %v1252_v3 = vld [vmem:[%s1535_s17 + $0x70] sm:$0xf0] }
  0x35   : > { %500 = vmatpush.bf16.msrb.mxu1 %v1167_v37  ;;  %v1243_v34 = vor.u32 %v1436_v26, %v1242_v25  ;;  %v1445_v37 = vld [vmem:[%s1535_s17 + $0x154] sm:$0xf]  ;;  %v1342_v61 = vld [vmem:[%s1535_s17 + $0xd8] sm:$0xf]  ;;  %v1467_v11 = vld [vmem:[%s1535_s17 + $0x1dc] sm:$0xf] }
  0x36   : > { %v1460_v63 = vld [vmem:[%s1535_s17 + $0xf4] sm:$0xf0]  ;;  %v1244_v9 = vld [vmem:[%s1535_s17 + $0x30] sm:$0xf0]  ;;  %v1376_v12 = vld [vmem:[%s1535_s17 + $0x1f8] sm:$0xf0] }
  0x37   : > { %532 = vmatpush.bf16.msrb.mxu0 %v1219_v36  ;;  %749 = vmatpush.bf16.msra.mxu2 %v1311_v59  ;;  %v1375_v36 = vor.u32 %v1468_v30, %v1374_v29  ;;  %v1260_v59 = vld [vmem:[%s1535_s17 + $0xb0] sm:$0xf0]  ;;  %v1343_v4 = vor.u32 %v1460_v63, %v1342_v61  ;;  %v1334_v5 = vld [vmem:[%s1535_s17 + $0x98] sm:$0xf]  ;;  %v1379_v17 = vor.u32 %v1467_v11, %v1376_v12  ;;  %v1465_v19 = vld [vmem:[%s1535_s17 + $0x19c] sm:$0xf] }
  0x38   : > { %501 = vmatmul.bf16.vlgmr.msrb.gmra.mxu1 %v1625_v31  ;;  %1236 = vmatmul.msk.bf16.vlgmr.msrb.gmra.mxu3 %vm302_vm0, %v1552_v15  ;;  %v1458_v6 = vld [vmem:[%s1535_s17 + $0xb4] sm:$0xf0]  ;;  %v1368_v20 = vld [vmem:[%s1535_s17 + $0x1b8] sm:$0xf0]  ;;  %v963_v45 = vld [vmem:[%s1839_s2 + $0x10] sm:$0xff] }
  0x39   : > { %685 = vmatpush.bf16.msra.mxu1 %v1299_v38  ;;  %711 = vmatpush.bf16.msrb.mxu3 %v1307_v53  ;;  %v1284_v38 = vld [vmem:[%s1535_s17 + $0x170] sm:$0xf0]  ;;  %v1335_v10 = vor.u32 %v1458_v6, %v1334_v5  ;;  %v1318_v21 = vld [vmem:[%s1535_s17 + $0x18] sm:$0xf]  ;;  %v1463_v25 = vld [vmem:[%s1535_s17 + $0x15c] sm:$0xf] }
  0x3a   : > { %v1268_v53 = vld [vmem:[%s1535_s17 + $0xf0] sm:$0xf0]  ;;  %v1360_v26 = vld [vmem:[%s1535_s17 + $0x178] sm:$0xf0]  ;;  %v962_v46 = vld [vmem:[%s1839_s2 + $0x8] sm:$0xff] }
  0x3b   : > { %533 = vmatpush.bf16.msrb.mxu0 %v1211_v43  ;;  %v1470_v43 = vld [vmem:[%s1535_s17 + $0x234] sm:$0xf0]  ;;  %v1363_v27 = vor.u32 %v1463_v25, %v1360_v26  ;;  %v1461_v28 = vld [vmem:[%s1535_s17 + $0x11c] sm:$0xf] }
  0x3c   : > { %v1383_v48 = vor.u32 %v1470_v43, %v1382_v42  ;;  %v1352_v29 = vld [vmem:[%s1535_s17 + $0x138] sm:$0xf0] }
  0x3d   : > { %686 = vmatpush.bf16.msra.mxu1 %v1291_v44  ;;  %v1287_v44 = vor.u32 %v1445_v37, %v1284_v38  ;;  %v1355_v30 = vor.u32 %v1461_v28, %v1352_v29  ;;  %v1459_v32 = vld [vmem:[%s1535_s17 + $0xdc] sm:$0xf]  ;;  %v961_v37 = vld [vmem:[%s1839_s2] sm:$0xff]  ;;  %v1500_v38 = vmov 0  }
  0x3e   : > { %v1344_v33 = vld [vmem:[%s1535_s17 + $0xf8] sm:$0xf0]  ;;  %1490 = vset.pattern.permute.xlu0 %v1500_v38  ;;  %1491 = vset.pattern.permute.xlu1 %v1500_v38 }
  0x3f   : > { %534 = vmatpush.bf16.msrb.mxu0 %v1203_v52  ;;  %v1441_v52 = vld [vmem:[%s1535_s17 + $0xd4] sm:$0xf]  ;;  %967 = vperm.xlu0 %1490, %v961_v37   ;;  %v1455_v40 = vld [vmem:[%s1535_s17 + $0x5c] sm:$0xf] }
  0x40   : > { %v1271_v57 = vor.u32 %v1441_v52, %v1268_v53  ;;  %v1328_v41 = vld [vmem:[%s1535_s17 + $0x78] sm:$0xf0]  ;;  %977 = vperm.xlu1 %1491, %v963_v45  }
  0x41   : > { %687 = vmatpush.bf16.msra.mxu1 %v1283_v55  ;;  %v1350_v55 = vld [vmem:[%s1535_s17 + $0x118] sm:$0xf]  ;;  %v1331_v42 = vor.u32 %v1455_v40, %v1328_v41  ;;  %v1453_v43 = vld [vmem:[%s1535_s17 + $0x1c] sm:$0xf] }
  0x42   : > { %322 = vmatmul.bf16.gmra.mxu0 %v1658_v1  ;;  %360 = vmatmul.bf16.gmra.mxu2 %v1658_v1  ;;  %v1351_v60 = vor.u32 %v1462_v56, %v1350_v55 }
  0x43   : > { %535 = vmatpush.bf16.msrb.mxu0 %v1195_v0  ;;  %v1263_v0 = vor.u32 %v1439_v58, %v1260_v59 }
  0x45   : > { %688 = vmatpush.bf16.msra.mxu1 %v1275_v2  ;;  %v1437_v2 = vld [vmem:[%s1535_s17 + $0x54] sm:$0xf] }
  0x47   : > { %536 = vmatpush.bf16.msrb.mxu0 %v1187_v7  ;;  %v1255_v7 = vor.u32 %v1437_v2, %v1252_v3  ;;  %972 = vperm.xlu0 %1490, %v962_v46  }
  0x48   : > { %506 = vmatmul.bf16.gmra.mxu1 %v1658_v1  ;;  %1237 = vmatmul.msk.bf16.gmra.mxu3 %vm302_vm0, %v1595_v62 }
  0x49   : > { %689 = vmatpush.bf16.msra.mxu1 %v1267_v8  ;;  %v1435_v8 = vld [vmem:[%s1535_s17 + $0x14] sm:$0xf] }
  0x4a   : > { %v1247_v16 = vor.u32 %v1435_v8, %v1244_v9 }
  0x4b   : > { %537 = vmatpush.bf16.msrb.mxu0 %v1179_v13  ;;  %v1326_v13 = vld [vmem:[%s1535_s17 + $0x58] sm:$0xf] }
  0x4d   : > { %690 = vmatpush.bf16.msra.mxu1 %v1259_v14  ;;  %v1456_v14 = vld [vmem:[%s1535_s17 + $0x74] sm:$0xf0] }
  0x4e   : > { %v1327_v18 = vor.u32 %v1456_v14, %v1326_v13 }
  0x4f   : > { %538 = vmatpush.bf16.msrb.mxu0 %v1171_v22  ;;  %v1454_v22 = vld [vmem:[%s1535_s17 + $0x34] sm:$0xf0] }
  0x51   : > { %691 = vmatpush.bf16.msra.mxu1 %v1251_v23  ;;  %v1371_v23 = vor.u32 %v1465_v19, %v1368_v20 }
  0x52   : > { %539 = vmatmul.bf16.vlgmr.msrb.gmra.mxu0 %v1625_v31  ;;  %1238 = vmatmul.msk.bf16.vlgmr.msrb.gmra.mxu2 %vm302_vm0, %v1552_v15 }
  0x53   : > { %723 = vmatpush.bf16.msra.mxu0 %v1303_v24  ;;  %941 = vmatpush.bf16.msrb.mxu2 %v1387_v39  ;;  %v1319_v24 = vor.u32 %v1454_v22, %v1318_v21 }
  0x55   : > { %692 = vmatpush.bf16.msra.mxu1 %v1243_v34  ;;  %v1347_v34 = vor.u32 %v1459_v32, %v1344_v33 }
  0x57   : > { %724 = vmatpush.bf16.msra.mxu0 %v1295_v35  ;;  %v1457_v35 = vld [vmem:[%s1535_s17 + $0x9c] sm:$0xf] }
  0x58   : > { %1239 = vmatmul.msk.bf16.vlgmr.msra.gmra.mxu3 %vm302_vm0, %v1595_v62  ;;  %693 = vmatmul.bf16.vlgmr.msra.gmra.mxu1 %v1625_v31 }
  0x59   : > { %877 = vmatpush.bf16.msrb.mxu1 %v1375_v36  ;;  %903 = vmatpush.bf16.msra.mxu3 %v1383_v48  ;;  %v1336_v36 = vld [vmem:[%s1535_s17 + $0xb8] sm:$0xf0] }
  0x5a   : > { %v1339_v39 = vor.u32 %v1457_v35, %v1336_v36  ;;  %v964_v48 = vld [vmem:[%s1839_s2 + $0x18] sm:$0xff] }
  0x5b   : > { %725 = vmatpush.bf16.msra.mxu0 %v1287_v44  ;;  %v1320_v44 = vld [vmem:[%s1535_s17 + $0x38] sm:$0xf0]  ;;  %982 = vperm.xlu1 %1491, %v964_v48   ;;  %s1394_s17 = sshll.u32 %s1842_s13, 5 }
  0x5c   : > { %s1818_s20 = scalar_lea.vmem %s1840_s3, %s1394_s17 }
  0x5d   : > { %878 = vmatpush.bf16.msrb.mxu1 %v1367_v47  ;;  %v1323_v47 = vor.u32 %v1453_v43, %v1320_v44 }
  0x5f   : > { %726 = vmatpush.bf16.msra.mxu0 %v1279_v51 }
  0x61   : > { %879 = vmatpush.bf16.msrb.mxu1 %v1359_v54 }
  0x62   : > { %544 = vmatmul.bf16.gmra.mxu0 %v1658_v1  ;;  %1314 = vmatmul.msk.bf16.vlgmr.msra.gmra.mxu2 %vm302_vm0, %v1552_v15 }
  0x63   : > { %727 = vmatpush.bf16.msra.mxu0 %v1271_v57 }
  0x65   : > { %880 = vmatpush.bf16.msrb.mxu1 %v1351_v60 }
  0x67   : > { %728 = vmatpush.bf16.msra.mxu0 %v1263_v0 }
  0x68   : > { %698 = vmatmul.bf16.gmra.mxu1 %v1658_v1  ;;  %1312 = vmatmul.msk.bf16.vlgmr.msrb.gmra.mxu3 %vm302_vm0, %v1552_v15 }
  0x69   : > { %881 = vmatpush.bf16.msrb.mxu1 %v1343_v4 }
  0x6b   : > { %729 = vmatpush.bf16.msra.mxu0 %v1255_v7 }
  0x6d   : > { %882 = vmatpush.bf16.msrb.mxu1 %v1335_v10 }
  0x6f   : > { %730 = vmatpush.bf16.msra.mxu0 %v1247_v16 }
  0x71   : > { %883 = vmatpush.bf16.msrb.mxu1 %v1327_v18 }
  0x72   : > { %731 = vmatmul.bf16.vlgmr.msra.gmra.mxu0 %v1625_v31  ;;  %1315 = vmatmul.msk.bf16.gmra.mxu2 %vm302_vm0, %v1595_v62 }
  0x73   : > { %915 = vmatpush.bf16.msrb.mxu0 %v1379_v17 }
  0x75   : > { %884 = vmatpush.bf16.msrb.mxu1 %v1319_v24 }
  0x77   : > { %916 = vmatpush.bf16.msrb.mxu0 %v1371_v23 }
  0x78   : > { %1313 = vmatmul.msk.bf16.gmra.mxu3 %vm302_vm0, %v1595_v62  ;;  %885 = vmatmul.bf16.vlgmr.msrb.gmra.mxu1 %v1625_v31 }
  0x79   : > { %1472 = vmatpush.bf16.msra.mxu1 %v1379_v17 }
  0x7b   : > { %917 = vmatpush.bf16.msrb.mxu0 %v1363_v27 }
  0x7d   : > { %1473 = vmatpush.bf16.msra.mxu1 %v1371_v23 }
  0x7f   : > { %918 = vmatpush.bf16.msrb.mxu0 %v1355_v30 }
  0x81   : > { %1474 = vmatpush.bf16.msra.mxu1 %v1363_v27 }
  0x82   : > { %736 = vmatmul.bf16.gmra.mxu0 %v1658_v1  ;;  %1390 = vmatmul.msk.bf16.vlgmr.msrb.gmra.mxu2 %vm302_vm0, %v1552_v15 }
  0x83   : > { %919 = vmatpush.bf16.msrb.mxu0 %v1347_v34 }
  0x85   : > { %1475 = vmatpush.bf16.msra.mxu1 %v1355_v30 }
  0x87   : > { %920 = vmatpush.bf16.msrb.mxu0 %v1339_v39 }
  0x88   : > { %890 = vmatmul.bf16.gmra.mxu1 %v1658_v1  ;;  %1388 = vmatmul.msk.bf16.vlgmr.msra.gmra.mxu3 %vm302_vm0, %v1552_v15 }
  0x89   : > { %1476 = vmatpush.bf16.msra.mxu1 %v1347_v34 }
  0x8b   : > { %921 = vmatpush.bf16.msrb.mxu0 %v1331_v42 }
  0x8d   : > { %1477 = vmatpush.bf16.msra.mxu1 %v1339_v39 }
  0x8f   : > { %922 = vmatpush.bf16.msrb.mxu0 %v1323_v47 }
  0x91   : > { %1478 = vmatpush.bf16.msra.mxu1 %v1331_v42 }
  0x92   : > { %923 = vmatmul.bf16.vlgmr.msrb.gmra.mxu0 %v1625_v31  ;;  %1391 = vmatmul.msk.bf16.gmra.mxu2 %vm302_vm0, %v1595_v62 }
  0x95   : > { %1479 = vmatpush.bf16.msra.mxu1 %v1323_v47  ;;  %v337_v49 = vpop.f32.mrf.mxu1 }
  0x98   : > { %1389 = vmatmul.msk.bf16.gmra.mxu3 %vm302_vm0, %v1595_v62  ;;  %928 = vmatmul.bf16.vlgmr.msra.gmra.mxu1 %v1658_v1 }
  0x9b   : > { %v375_v15 = vpop.f32.mrf.mxu3 }
  0x9d   : > { %v339_v50 = vpop.f32.mrf.mxu1 }
  0xa3   : > { %v377_v51 = vpop.f32.mrf.mxu3 }
  0xa5   : > { %v342_v52 = vpop.f32.mrf.mxu1 }
  0xab   : > { %v380_v53 = vpop.f32.mrf.mxu3 }
  0xad   : > { %v344_v54 = vpop.f32.mrf.mxu1 }
  0xaf   : > { %v318_v55 = vpop.f32.mrf.mxu0 }
  0xb0   : > { %v1773_v56 = vadd.f32 %v337_v49, %v318_v55 }
  0xb3   : > { %v382_v57 = vpop.f32.mrf.mxu3 }
  0xb5   : > { %v502_v31 = vpop.f32.mrf.mxu1  ;;  %v356_v58 = vpop.f32.mrf.mxu2 }
  0xb6   : > { %v1775_v59 = vadd.f32 %v375_v15, %v356_v58  ;;  %v968_v58 = vpop.permute.xlu0 %967 }
  0xb7   : > { %v320_v60 = vpop.f32.mrf.mxu0 }
  0xb8   : > { %v1777_v61 = vadd.f32 %v339_v50, %v320_v60 }
  0xbb   : > { %v521_v62 = vpop.f32.mrf.mxu3 }
  0xbc   : > { %v522_v63 = vadd.f32 %v521_v62, %v502_v31 }
  0xbd   : > { %v504_v1 = vpop.f32.mrf.mxu1  ;;  %v358_v2 = vpop.f32.mrf.mxu2 }
  0xbe   : > { %v569_v0 = vmax.f32 %v1773_v56, %v522_v63  ;;  %v1780_v3 = vadd.f32 %v377_v51, %v358_v2 }
  0xbf   : > { %v323_v4 = vpop.f32.mrf.mxu0 }
  0xc0   : > { %v1782_v5 = vadd.f32 %v342_v52, %v323_v4 }
  0xc3   : > { %v523_v6 = vpop.f32.mrf.mxu3 }
  0xc4   : > { %v1784_v7 = vadd.f32 %v523_v6, %v504_v1 }
  0xc5   : > { %v507_v8 = vpop.f32.mrf.mxu1  ;;  %v361_v10 = vpop.f32.mrf.mxu2 }
  0xc6   : > { %v571_v9 = vmax.f32 %v1777_v61, %v1784_v7  ;;  %v1788_v11 = vadd.f32 %v380_v53, %v361_v10  ;;  %v973_v61 = vpop.permute.xlu0 %972 }
  0xc7   : > { %v325_v12 = vpop.f32.mrf.mxu0 }
  0xc8   : > { %v1790_v13 = vadd.f32 %v344_v54, %v325_v12 }
  0xcb   : > { %v526_v14 = vpop.f32.mrf.mxu3 }
  0xcc   : > { %v1792_v16 = vadd.f32 %v526_v14, %v507_v8 }
  0xcd   : > { %v509_v17 = vpop.f32.mrf.mxu1  ;;  %v363_v19 = vpop.f32.mrf.mxu2 }
  0xce   : > { %v573_v18 = vmax.f32 %v1782_v5, %v1792_v16  ;;  %v1796_v20 = vadd.f32 %v382_v57, %v363_v19 }
  0xcf   : > { %v540_v21 = vpop.f32.mrf.mxu0 }
  0xd3   : > { %v528_v22 = vpop.f32.mrf.mxu3 }
  0xd4   : > { %v1798_v23 = vadd.f32 %v528_v22, %v509_v17 }
  0xd5   : > { %v694_v24 = vpop.f32.mrf.mxu1  ;;  %v559_v26 = vpop.f32.mrf.mxu2 }
  0xd6   : > { %v575_v25 = vmax.f32 %v1790_v13, %v1798_v23  ;;  %v560_v53 = vadd.f32 %v559_v26, %v540_v21 }
  0xd7   : > { %v542_v27 = vpop.f32.mrf.mxu0 }
  0xd8   : > { %v570_v60 = vmax.f32 %v1775_v59, %v560_v53 }
  0xdb   : > { %v564_v28 = vpop.f32.mrf.mxu3 }
  0xdd   : > { %v696_v29 = vpop.f32.mrf.mxu1  ;;  %v561_v30 = vpop.f32.mrf.mxu2 }
  0xde   : > { %v562_v8 = vadd.f32 %v561_v30, %v542_v27 }
  0xdf   : > { %v545_v32 = vpop.f32.mrf.mxu0 }
  0xe0   : > { %v565_v10 = vadd.f32 %v564_v28, %v545_v32 }
  0xe3   : > { %v566_v33 = vpop.f32.mrf.mxu3 }
  0xe5   : > { %v699_v34 = vpop.f32.mrf.mxu1  ;;  %v751_v35 = vpop.f32.mrf.mxu2 }
  0xe7   : > { %v547_v36 = vpop.f32.mrf.mxu0 }
  0xeb   : > { %v713_v37 = vpop.f32.mrf.mxu3 }
  0xec   : > { %v714_v52 = vadd.f32 %v713_v37, %v694_v24  ;;  %v572_v24 = vmax.f32 %v1780_v3, %v562_v8 }
  0xed   : > { %v1802_v38 = vpop.f32.mrf.mxu1  ;;  %v753_v39 = vpop.f32.mrf.mxu2 }
  0xee   : > { %v761_v55 = vmax.f32 %v569_v0, %v714_v52 }
  0xef   : > { %v732_v40 = vpop.f32.mrf.mxu0 }
  0xf0   : > { %v752_v56 = vadd.f32 %v751_v35, %v732_v40 }
  0xf2   : > { %v762_v2 = vmax.f32 %v570_v60, %v752_v56 }
  0xf3   : > { %v715_v41 = vpop.f32.mrf.mxu3 }
  0xf4   : > { %v716_v4 = vadd.f32 %v715_v41, %v696_v29  ;;  %v574_v29 = vmax.f32 %v1788_v11, %v565_v10  ;;  %v567_v41 = vadd.f32 %v566_v33, %v547_v36 }
  0xf5   : > { %v886_v42 = vpop.f32.mrf.mxu1  ;;  %v756_v43 = vpop.f32.mrf.mxu2 }
  0xf6   : > { %v763_v19 = vmax.f32 %v571_v9, %v716_v4 }
  0xf7   : > { %v734_v44 = vpop.f32.mrf.mxu0 }
  0xf8   : > { %v754_v17 = vadd.f32 %v753_v39, %v734_v44  ;;  %v978_v44 = vpop.permute.xlu1 %977 }
  0xfa   : > { %v764_v32 = vmax.f32 %v572_v24, %v754_v17 }
  0xfb   : > { %v718_v45 = vpop.f32.mrf.mxu3 }
  0xfc   : > { %v719_v37 = vadd.f32 %v718_v45, %v699_v34  ;;  %v576_v34 = vmax.f32 %v1796_v20, %v567_v41 }
  0xfd   : > { %v888_v46 = vpop.f32.mrf.mxu1  ;;  %v758_v47 = vpop.f32.mrf.mxu2 }
  0xff   : > { %v737_v48 = vpop.f32.mrf.mxu0 }
 0x100   : > { %v757_v21 = vadd.f32 %v756_v43, %v737_v48  ;;  %v765_v48 = vmax.f32 %v573_v18, %v719_v37 }
 0x102   : > { %v766_v39 = vmax.f32 %v574_v29, %v757_v21 }
 0x103   : > { %v1804_v49 = vpop.f32.mrf.mxu3 }
 0x105   : > { %v891_v15 = vpop.f32.mrf.mxu1  ;;  %v943_v50 = vpop.f32.mrf.mxu2 }
 0x107   : > { %v739_v51 = vpop.f32.mrf.mxu0 }
 0x10b   : > { %v905_v54 = vpop.f32.mrf.mxu3 }
 0x10c   : > { %v906_v57 = vadd.f32 %v905_v54, %v886_v42 }
 0x10d   : > { %v1806_v31 = vpop.f32.mrf.mxu1  ;;  %v945_v63 = vpop.f32.mrf.mxu2 }
 0x10e   : > { %v953_v62 = vmax.f32 %v761_v55, %v906_v57 }
 0x10f   : > { %v924_v1 = vpop.f32.mrf.mxu0 }
 0x110   : > { %v944_v6 = vadd.f32 %v943_v50, %v924_v1  ;;  %v985_v12 = vadd.f32 %v968_v58, %v953_v62  ;;  %v759_v50 = vadd.f32 %v758_v47, %v739_v51  ;;  %v983_v1 = vpop.permute.xlu1 %982 }
 0x112   : > { %v954_v14 = vmax.f32 %v762_v2, %v944_v6  ;;  %v993_v35 = vmax.f32 %v985_v12, 0.0  ;;  %v768_v60 = vmax.f32 %v576_v34, %v759_v50 }
 0x113   : > { %v907_v0 = vpop.f32.mrf.mxu3 }
 0x114   : > { %v986_v22 = vadd.f32 %v968_v58, %v954_v14  ;;  %v908_v59 = vadd.f32 %v907_v0, %v888_v46  ;;  %v721_v58 = vadd.f32 %v1804_v49, %v1802_v38 }
 0x115   : > { %v929_v26 = vpop.f32.mrf.mxu1  ;;  %v948_v30 = vpop.f32.mrf.mxu2 }
 0x116   : > { %v994_v27 = vmax.f32 %v986_v22, 0.0  ;;  %v955_v28 = vmax.f32 %v763_v19, %v908_v59  ;;  %v949_v7 = vadd.f32 %v948_v30, %v929_v26  ;;  %v767_v51 = vmax.f32 %v575_v25, %v721_v58 }
 0x117   : > { %v926_v9 = vpop.f32.mrf.mxu0 }
 0x118   : > { %v1001_v3 = vpack.c.bf16 %v994_v27, %v993_v35  ;;  %v946_v40 = vadd.f32 %v945_v63, %v926_v9  ;;  %v987_v11 = vadd.f32 %v973_v61, %v955_v28  ;;  %v958_v42 = vmax.f32 %v766_v39, %v949_v7 }
 0x11a   : > { %1005 = vst [vmem:[%s1818_s20] sm:$0xff] %v1001_v3  ;;  %v956_v43 = vmax.f32 %v764_v32, %v946_v40  ;;  %v995_v45 = vmax.f32 %v987_v11, 0.0  ;;  %v990_v54 = vadd.f32 %v978_v44, %v958_v42 }
 0x11b   : > { %v910_v46 = vpop.f32.mrf.mxu3 }
 0x11c   : > { %v988_v52 = vadd.f32 %v973_v61, %v956_v43  ;;  %v911_v53 = vadd.f32 %v910_v46, %v891_v15  ;;  %v998_v18 = vmax.f32 %v990_v54, 0.0 }
 0x11d   : > { %v931_v36 = vpop.f32.mrf.mxu1  ;;  %v950_v56 = vpop.f32.mrf.mxu2 }
 0x11e   : > { %v996_v55 = vmax.f32 %v988_v52, 0.0  ;;  %v957_v33 = vmax.f32 %v765_v48, %v911_v53  ;;  %v951_v57 = vadd.f32 %v950_v56, %v931_v36 }
 0x120   : > { %v1002_v5 = vpack.c.bf16 %v996_v55, %v995_v45  ;;  %v989_v16 = vadd.f32 %v978_v44, %v957_v33  ;;  %v960_v15 = vmax.f32 %v768_v60, %v951_v57 }
 0x122   : > { %1006 = vst [vmem:[%s1818_s20 + $0x8] sm:$0xff] %v1002_v5  ;;  %v997_v47 = vmax.f32 %v989_v16, 0.0  ;;  %v992_v2 = vadd.f32 %v983_v1, %v960_v15 }
 0x123   : > { %v912_v20 = vpop.f32.mrf.mxu3 }
 0x124   : > { %v1003_v62 = vpack.c.bf16 %v998_v18, %v997_v47  ;;  %v913_v63 = vadd.f32 %v912_v20, %v1806_v31  ;;  %v1000_v4 = vmax.f32 %v992_v2, 0.0 }
 0x126   : > { %1007 = vst [vmem:[%s1818_s20 + $0x10] sm:$0xff] %v1003_v62  ;;  %v959_v38 = vmax.f32 %v767_v51, %v913_v63 }
 0x128   : > { %v991_v49 = vadd.f32 %v983_v1, %v959_v38 }
 0x12a   : > { %v999_v6 = vmax.f32 %v991_v49, 0.0 }
 0x12c   : > { %v1004_v8 = vpack.c.bf16 %v1000_v4, %v999_v6 }
 0x12e   : > { %1008 = vst [vmem:[%s1818_s20 + $0x18] sm:$0xff] %v1004_v8 }
 0x12f PF: > { %s13_s12 = sadd.s32 1, %s1498_s12  }
 0x130   : > { %p10_p4 = scmp.ge.s32.totalorder %s13_s12, 4  }
 0x132   :  { %12 = sbr.rel (!%p10_p4) target bundleno = 1 (0x1), region = 62 }

// kernel: multimodal_classifier_forward.5
= control target key start
LH: loop header
LB: loop body
LE: loop exit
PB: predicated region body
PF: predicated region fallthrough
CT: control target
= control target key end

     0   :  { %12 = vsyncpa [#allocation4], 0  ;;  %s2268_s24 = smov 0   ;;  %s2546_s0 = inlined_call_operand.vmem [shape: bf16[2,8192], index: 0, kind: input, shape index: {}]   ;;  %s2547_s1 = inlined_call_operand.vmem [shape: bf16[8192,128], index: 1, kind: input, shape index: {}]   ;;  %s2548_s2 = inlined_call_operand.vmem [shape: bf16[2,768], index: 2, kind: input, shape index: {}]   ;;  %s2549_s3 = inlined_call_operand.vmem [shape: bf16[768,128], index: 3, kind: input, shape index: {}]   ;;  %s2550_s4 = inlined_call_operand.vmem [shape: f32[1,128], index: 4, kind: input, shape index: {}]   ;;  %s2551_s5 = inlined_call_operand.vmem [shape: bf16[128,7], index: 5, kind: input, shape index: {}]   ;;  %s2552_s6 = inlined_call_operand.vmem [shape: f32[1,7], index: 6, kind: input, shape index: {}]   ;;  %s2553_s7 = inlined_call_operand.hbm [shape: f32[2,7], index: 7, kind: output, shape index: {}]  }
   0x1 LB: > { %s2274_s25 = sadd.s32 4294967295, %s2225_s24   ;;  %p1560_p0 = scmp.ge.s32.totalorder %s2225_s24, 1  ;;  %s2225_s24 = sphi %s2268_s24, %s18_s24  }
   0x2   : > { %p244_p1 = scmp.lt.s32.totalorder %s2225_s24, 9 }
   0x4   : > { %p245_p2 = pnand %p1560_p0, %p244_p1 }
   0x5   : > { %s1561_s26 = sshll.u32 (!%p245_p2), %s2274_s25, 3  ;;  %s1562_s27 = sshll.u32 (!%p245_p2), %s2274_s25, 7 }
   0x6   : > { %248 = sbr.rel (%p245_p2) target bundleno = 595 (0x253), region = 48  ;;  %p276_p3 = scmp.lt.s32.totalorder (!%p245_p2), %s1561_s26, 63 }
   0x7   : > { %p281_p4 = scmp.lt.s32.totalorder (!%p245_p2), %s1562_s27, 1023  ;;  %p1564_p5 = scmp.ne.s32.totalorder (!%p245_p2), %s2274_s25, 0 }
   0xb   : > { %s2555_s26 = smov (!%p276_p3, %s1561_s26), 63  ;;  %s2557_s27 = smov (!%p281_p4, %s1562_s27), 1023 }
   0xc   : > { %s278_s30 = scalar_lea.vmem %s2546_s0, %s2555_s26  ;;  %s1563_s8 = sshll.u32 %s2557_s27, 2 }
   0xd   : > { %s2289_s11 = scalar_lea.vmem %s2547_s1, %s1563_s8  ;;  %289 = sbr.rel (%p1564_p5) target bundleno = 217 (0xd9), region = 52 }
  0x12   : > { %v2057_v0 = vld [vmem:[%s2549_s3 + $0x38] sm:$0xff]  ;;  %v2056_v2 = vld [vmem:[%s2549_s3 + $0x30] sm:$0xff]  ;;  %v2055_v8 = vld [vmem:[%s2549_s3 + $0x28] sm:$0xff] }
  0x13   : > { %v2065_v1 = vld [vmem:[%s2549_s3 + $0x78] sm:$0xff]  ;;  %693 = vmatpush.bf16.msra.mxu0 %v2057_v0  ;;  %v2064_v3 = vld [vmem:[%s2549_s3 + $0x70] sm:$0xff]  ;;  %v2063_v9 = vld [vmem:[%s2549_s3 + $0x68] sm:$0xff] }
  0x14   : > { %706 = vmatpush.bf16.msra.mxu1 %v2065_v1  ;;  %v2073_v4 = vld [vmem:[%s2549_s3 + $0xb8] sm:$0xff]  ;;  %v2072_v6 = vld [vmem:[%s2549_s3 + $0xb0] sm:$0xff]  ;;  %v2071_v10 = vld [vmem:[%s2549_s3 + $0xa8] sm:$0xff] }
  0x15   : > { %v2081_v5 = vld [vmem:[%s2549_s3 + $0xf8] sm:$0xff]  ;;  %719 = vmatpush.bf16.msra.mxu2 %v2073_v4  ;;  %v2080_v7 = vld [vmem:[%s2549_s3 + $0xf0] sm:$0xff]  ;;  %v2079_v11 = vld [vmem:[%s2549_s3 + $0xe8] sm:$0xff] }
  0x16   : > { %732 = vmatpush.bf16.msra.mxu3 %v2081_v5  ;;  %v2054_v12 = vld [vmem:[%s2549_s3 + $0x20] sm:$0xff]  ;;  %v2053_v17 = vld [vmem:[%s2549_s3 + $0x18] sm:$0xff]  ;;  %v2052_v21 = vld [vmem:[%s2549_s3 + $0x10] sm:$0xff] }
  0x17   : > { %694 = vmatpush.bf16.msra.mxu0 %v2056_v2  ;;  %v2062_v13 = vld [vmem:[%s2549_s3 + $0x60] sm:$0xff]  ;;  %v2061_v18 = vld [vmem:[%s2549_s3 + $0x58] sm:$0xff]  ;;  %v2060_v22 = vld [vmem:[%s2549_s3 + $0x50] sm:$0xff] }
  0x18   : > { %707 = vmatpush.bf16.msra.mxu1 %v2064_v3  ;;  %v290_v14 = vld [vmem:[%s2548_s2] sm:$0x3f]  ;;  %v2069_v19 = vld [vmem:[%s2549_s3 + $0x98] sm:$0xff]  ;;  %v2068_v23 = vld [vmem:[%s2549_s3 + $0x90] sm:$0xff] }
  0x19   : > { %720 = vmatpush.bf16.msra.mxu2 %v2072_v6  ;;  %v2070_v15 = vld [vmem:[%s2549_s3 + $0xa0] sm:$0xff]  ;;  %392 = vst [vmem:[#allocation1] ss:$9 sm:$0xff] %v290_v14  ;;  %v2077_v20 = vld [vmem:[%s2549_s3 + $0xd8] sm:$0xff]  ;;  %v2076_v24 = vld [vmem:[%s2549_s3 + $0xd0] sm:$0xff] }
  0x1a   : > { %733 = vmatpush.bf16.msra.mxu3 %v2080_v7  ;;  %v2078_v16 = vld [vmem:[%s2549_s3 + $0xe0] sm:$0xff]  ;;  %v2051_v25 = vld [vmem:[%s2549_s3 + $0x8] sm:$0xff]  ;;  %v2089_v31 = vld [vmem:[%s2549_s3 + $0x138] sm:$0xff] }
  0x1b   : > { %695 = vmatpush.bf16.msra.mxu0 %v2055_v8  ;;  %v2059_v26 = vld [vmem:[%s2549_s3 + $0x48] sm:$0xff]  ;;  %v2050_v29 = vld [vmem:[%s2549_s3] sm:$0xff]  ;;  %v2097_v32 = vld [vmem:[%s2549_s3 + $0x178] sm:$0xff] }
  0x1c   : > { %708 = vmatpush.bf16.msra.mxu1 %v2063_v9  ;;  %v2067_v27 = vld [vmem:[%s2549_s3 + $0x88] sm:$0xff]  ;;  %v2058_v30 = vld [vmem:[%s2549_s3 + $0x40] sm:$0xff]  ;;  %v2088_v37 = vld [vmem:[%s2549_s3 + $0x130] sm:$0xff] }
  0x1d   : > { %721 = vmatpush.bf16.msra.mxu2 %v2071_v10  ;;  %v2075_v28 = vld [vmem:[%s2549_s3 + $0xc8] sm:$0xff]  ;;  %v2066_v33 = vld [vmem:[%s2549_s3 + $0x80] sm:$0xff]  ;;  %v2096_v38 = vld [vmem:[%s2549_s3 + $0x170] sm:$0xff] }
  0x1e   : > { %734 = vmatpush.bf16.msra.mxu3 %v2079_v11  ;;  %v2074_v34 = vld [vmem:[%s2549_s3 + $0xc0] sm:$0xff]  ;;  %v2087_v41 = vld [vmem:[%s2549_s3 + $0x128] sm:$0xff]  ;;  %v2085_v45 = vld [vmem:[%s2549_s3 + $0x118] sm:$0xff] }
  0x1f   : > { %696 = vmatpush.bf16.msra.mxu0 %v2054_v12  ;;  %v2095_v42 = vld [vmem:[%s2549_s3 + $0x168] sm:$0xff]  ;;  %v2086_v43 = vld [vmem:[%s2549_s3 + $0x120] sm:$0xff]  ;;  %v2093_v46 = vld [vmem:[%s2549_s3 + $0x158] sm:$0xff] }
  0x20   : > { %709 = vmatpush.bf16.msra.mxu1 %v2062_v13  ;;  %v393_v35 = vld [vmem:[#allocation1] sm:$0xff]  ;;  %v394_v36 = vld [vmem:[#allocation1 + $0x9] sm:$0xff]  ;;  %v395_v39 = vld [vmem:[#allocation1 + $0x12] sm:$0xff] }
  0x21   : > { %722 = vmatpush.bf16.msra.mxu2 %v2070_v15  ;;  %v396_v40 = vld [vmem:[#allocation1 + $0x1b] sm:$0xff]  ;;  %v2084_v47 = vld [vmem:[%s2549_s3 + $0x110] sm:$0xff]  ;;  %v2083_v49 = vld [vmem:[%s2549_s3 + $0x108] sm:$0xff] }
  0x22   : > { %735 = vmatpush.bf16.msra.mxu3 %v2078_v16  ;;  %v2094_v44 = vld [vmem:[%s2549_s3 + $0x160] sm:$0xff]  ;;  %v2092_v48 = vld [vmem:[%s2549_s3 + $0x150] sm:$0xff]  ;;  %v2091_v50 = vld [vmem:[%s2549_s3 + $0x148] sm:$0xff] }
  0x23   : > { %697 = vmatpush.bf16.msra.mxu0 %v2053_v17  ;;  %v2082_v51 = vld [vmem:[%s2549_s3 + $0x100] sm:$0xff]  ;;  %v398_v54 = vld [vmem:[#allocation1 + $0x2d] sm:$0xff] }
  0x24   : > { %710 = vmatpush.bf16.msra.mxu1 %v2061_v18  ;;  %v2090_v52 = vld [vmem:[%s2549_s3 + $0x140] sm:$0xff] }
  0x25   : > { %723 = vmatpush.bf16.msra.mxu2 %v2069_v19  ;;  %v397_v53 = vld [vmem:[#allocation1 + $0x24] sm:$0xff]  ;;  %v2185_v61 = vld [vmem:[%s2550_s4] ss:$0 sm:$0xff] }
  0x26   : > { %736 = vmatpush.bf16.msra.mxu3 %v2077_v20 }
  0x27   : > { %698 = vmatpush.bf16.msra.mxu0 %v2052_v21 }
  0x28   : > { %711 = vmatpush.bf16.msra.mxu1 %v2060_v22 }
  0x29   : > { %724 = vmatpush.bf16.msra.mxu2 %v2068_v23 }
  0x2a   : > { %737 = vmatpush.bf16.msra.mxu3 %v2076_v24 }
  0x2b   : > { %699 = vmatpush.bf16.msra.mxu0 %v2051_v25 }
  0x2c   : > { %712 = vmatpush.bf16.msra.mxu1 %v2059_v26 }
  0x2d   : > { %725 = vmatpush.bf16.msra.mxu2 %v2067_v27 }
  0x2e   : > { %738 = vmatpush.bf16.msra.mxu3 %v2075_v28 }
  0x2f   : > { %700 = vmatpush.bf16.msra.mxu0 %v2050_v29 }
  0x30   : > { %713 = vmatpush.bf16.msra.mxu1 %v2058_v30 }
  0x31   : > { %726 = vmatpush.bf16.msra.mxu2 %v2066_v33 }
  0x32   : > { %739 = vmatpush.bf16.msra.mxu3 %v2074_v34  ;;  %701 = vmatmul.bf16.vlgmr.msra.gmra.mxu0 %v393_v35 }
  0x33   : > { %745 = vmatpush.bf16.msrb.mxu0 %v2089_v31  ;;  %714 = vmatmul.bf16.vlgmr.msra.gmra.mxu1 %v394_v36 }
  0x34   : > { %758 = vmatpush.bf16.msrb.mxu1 %v2097_v32  ;;  %727 = vmatmul.bf16.vlgmr.msra.gmra.mxu2 %v395_v39 }
  0x35   : > { %740 = vmatmul.bf16.vlgmr.msra.gmra.mxu3 %v396_v40 }
  0x37   : > { %746 = vmatpush.bf16.msrb.mxu0 %v2088_v37 }
  0x38   : > { %759 = vmatpush.bf16.msrb.mxu1 %v2096_v38 }
  0x3b   : > { %747 = vmatpush.bf16.msrb.mxu0 %v2087_v41 }
  0x3c   : > { %760 = vmatpush.bf16.msrb.mxu1 %v2095_v42 }
  0x3f   : > { %748 = vmatpush.bf16.msrb.mxu0 %v2086_v43 }
  0x40   : > { %761 = vmatpush.bf16.msrb.mxu1 %v2094_v44 }
  0x43   : > { %749 = vmatpush.bf16.msrb.mxu0 %v2085_v45 }
  0x44   : > { %762 = vmatpush.bf16.msrb.mxu1 %v2093_v46 }
  0x47   : > { %750 = vmatpush.bf16.msrb.mxu0 %v2084_v47 }
  0x48   : > { %763 = vmatpush.bf16.msrb.mxu1 %v2092_v48 }
  0x4b   : > { %751 = vmatpush.bf16.msrb.mxu0 %v2083_v49 }
  0x4c   : > { %764 = vmatpush.bf16.msrb.mxu1 %v2091_v50 }
  0x4f   : > { %752 = vmatpush.bf16.msrb.mxu0 %v2082_v51 }
  0x50   : > { %765 = vmatpush.bf16.msrb.mxu1 %v2090_v52 }
  0x52   : > { %753 = vmatmul.bf16.vlgmr.msrb.gmra.mxu0 %v397_v53 }
  0x53   : > { %766 = vmatmul.bf16.vlgmr.msrb.gmra.mxu1 %v398_v54 }
  0xaf   : > { %v702_v55 = vpop.f32.mrf.mxu0 }
  0xb0   : > { %v715_v56 = vpop.f32.mrf.mxu1  ;;  %v703_v62 = vadd.f32 %v2185_v61, %v702_v55 }
  0xb2   : > { %v716_v1 = vadd.f32 %v715_v56, %v703_v62 }
  0xb7   : > { %v704_v57 = vpop.f32.mrf.mxu0  ;;  %v728_v59 = vpop.f32.mrf.mxu2 }
  0xb8   : > { %v717_v58 = vpop.f32.mrf.mxu1  ;;  %v741_v60 = vpop.f32.mrf.mxu3  ;;  %v729_v2 = vadd.f32 %v728_v59, %v716_v1 }
  0xba   : > { %v742_v3 = vadd.f32 %v741_v60, %v729_v2 }
  0xbf   : > { %v730_v63 = vpop.f32.mrf.mxu2 }
  0xc0   : > { %v743_v0 = vpop.f32.mrf.mxu3 }
  0xcf   : > { %v754_v4 = vpop.f32.mrf.mxu0 }
  0xd0   : > { %v767_v5 = vpop.f32.mrf.mxu1  ;;  %v755_v6 = vadd.f32 %v754_v4, %v742_v3 }
  0xd2   : > { %v768_v7 = vadd.f32 %v767_v5, %v755_v6 }
  0xd4   : > { %771 = vst [vmem:[#allocation2] sm:$0x3] %v768_v7 }
  0xd7   : > { %v756_v8 = vpop.f32.mrf.mxu0 }
  0xd8   : > { %v769_v9 = vpop.f32.mrf.mxu1 }
  0xd9 PF: > { %v2105_v10 = vld [vmem:[%s2289_s11 + $0x38] sm:$0xff]  ;;  %v2104_v14 = vld [vmem:[%s2289_s11 + $0x30] sm:$0xff]  ;;  %v2103_v18 = vld [vmem:[%s2289_s11 + $0x28] sm:$0xff]  ;;  %p2013_p6 = scmp.ne.s32.totalorder %s2274_s25, 7 }
  0xda   : > { %v2113_v11 = vld [vmem:[%s2289_s11 + $0x78] sm:$0xff]  ;;  %1304 = vmatpush.bf16.msra.mxu0 %v2105_v10  ;;  %v2112_v15 = vld [vmem:[%s2289_s11 + $0x70] sm:$0xff]  ;;  %v2111_v19 = vld [vmem:[%s2289_s11 + $0x68] sm:$0xff] }
  0xdb   : > { %v2121_v12 = vld [vmem:[%s2289_s11 + $0xb8] sm:$0xff]  ;;  %1317 = vmatpush.bf16.msra.mxu1 %v2113_v11  ;;  %v2120_v16 = vld [vmem:[%s2289_s11 + $0xb0] sm:$0xff]  ;;  %v2119_v20 = vld [vmem:[%s2289_s11 + $0xa8] sm:$0xff] }
  0xdc   : > { %v2129_v13 = vld [vmem:[%s2289_s11 + $0xf8] sm:$0xff]  ;;  %1330 = vmatpush.bf16.msra.mxu2 %v2121_v12  ;;  %v2128_v17 = vld [vmem:[%s2289_s11 + $0xf0] sm:$0xff]  ;;  %v2127_v21 = vld [vmem:[%s2289_s11 + $0xe8] sm:$0xff] }
  0xdd   : > { %1343 = vmatpush.bf16.msra.mxu3 %v2129_v13  ;;  %v2102_v22 = vld [vmem:[%s2289_s11 + $0x20] sm:$0xff]  ;;  %v2101_v27 = vld [vmem:[%s2289_s11 + $0x18] sm:$0xff]  ;;  %v2100_v31 = vld [vmem:[%s2289_s11 + $0x10] sm:$0xff] }
  0xde   : > { %1305 = vmatpush.bf16.msra.mxu0 %v2104_v14  ;;  %v2110_v23 = vld [vmem:[%s2289_s11 + $0x60] sm:$0xff]  ;;  %v2109_v28 = vld [vmem:[%s2289_s11 + $0x58] sm:$0xff]  ;;  %v2108_v32 = vld [vmem:[%s2289_s11 + $0x50] sm:$0xff] }
  0xdf   : > { %1318 = vmatpush.bf16.msra.mxu1 %v2112_v15  ;;  %v2118_v24 = vld [vmem:[%s2289_s11 + $0xa0] sm:$0xff]  ;;  %v2117_v29 = vld [vmem:[%s2289_s11 + $0x98] sm:$0xff]  ;;  %v2116_v33 = vld [vmem:[%s2289_s11 + $0x90] sm:$0xff] }
  0xe0   : > { %1331 = vmatpush.bf16.msra.mxu2 %v2120_v16  ;;  %v2126_v25 = vld [vmem:[%s2289_s11 + $0xe0] sm:$0xff]  ;;  %v2125_v30 = vld [vmem:[%s2289_s11 + $0xd8] sm:$0xff]  ;;  %v2124_v34 = vld [vmem:[%s2289_s11 + $0xd0] sm:$0xff] }
  0xe1   : > { %1344 = vmatpush.bf16.msra.mxu3 %v2128_v17  ;;  %v773_v26 = vld [vmem:[%s278_s30] sm:$0xff]  ;;  %v2099_v35 = vld [vmem:[%s2289_s11 + $0x8] sm:$0xff]  ;;  %v2137_v43 = vld [vmem:[%s2289_s11 + $0x138] sm:$0xff] }
  0xe2   : > { %1306 = vmatpush.bf16.msra.mxu0 %v2103_v18  ;;  %903 = vst [vmem:[#allocation1] ss:$9 sm:$0xff] %v773_v26  ;;  %v2107_v36 = vld [vmem:[%s2289_s11 + $0x48] sm:$0xff]  ;;  %v2098_v39 = vld [vmem:[%s2289_s11] sm:$0xff]  ;;  %v2145_v44 = vld [vmem:[%s2289_s11 + $0x178] sm:$0xff] }
  0xe3   : > { %1319 = vmatpush.bf16.msra.mxu1 %v2111_v19  ;;  %v2115_v37 = vld [vmem:[%s2289_s11 + $0x88] sm:$0xff]  ;;  %v2106_v40 = vld [vmem:[%s2289_s11 + $0x40] sm:$0xff]  ;;  %v2153_v45 = vld [vmem:[%s2289_s11 + $0x1b8] sm:$0xff] }
  0xe4   : > { %1332 = vmatpush.bf16.msra.mxu2 %v2119_v20  ;;  %v2123_v38 = vld [vmem:[%s2289_s11 + $0xc8] sm:$0xff]  ;;  %v2114_v41 = vld [vmem:[%s2289_s11 + $0x80] sm:$0xff]  ;;  %v2161_v46 = vld [vmem:[%s2289_s11 + $0x1f8] sm:$0xff] }
  0xe5   : > { %1345 = vmatpush.bf16.msra.mxu3 %v2127_v21  ;;  %v2122_v42 = vld [vmem:[%s2289_s11 + $0xc0] sm:$0xff]  ;;  %v2136_v47 = vld [vmem:[%s2289_s11 + $0x130] sm:$0xff]  ;;  %v2135_v55 = vld [vmem:[%s2289_s11 + $0x128] sm:$0xff] }
  0xe6   : > { %1307 = vmatpush.bf16.msra.mxu0 %v2102_v22  ;;  %v2144_v50 = vld [vmem:[%s2289_s11 + $0x170] sm:$0xff]  ;;  %v2143_v56 = vld [vmem:[%s2289_s11 + $0x168] sm:$0xff]  ;;  %v2134_v59 = vld [vmem:[%s2289_s11 + $0x120] sm:$0xff] }
  0xe7   : > { %1320 = vmatpush.bf16.msra.mxu1 %v2110_v23  ;;  %v2152_v53 = vld [vmem:[%s2289_s11 + $0x1b0] sm:$0xff]  ;;  %v2151_v57 = vld [vmem:[%s2289_s11 + $0x1a8] sm:$0xff]  ;;  %v2142_v60 = vld [vmem:[%s2289_s11 + $0x160] sm:$0xff] }
  0xe8   : > { %1333 = vmatpush.bf16.msra.mxu2 %v2118_v24  ;;  %v2160_v54 = vld [vmem:[%s2289_s11 + $0x1f0] sm:$0xff]  ;;  %v2159_v58 = vld [vmem:[%s2289_s11 + $0x1e8] sm:$0xff]  ;;  %v2150_v61 = vld [vmem:[%s2289_s11 + $0x1a0] sm:$0xff] }
  0xe9   : > { %1346 = vmatpush.bf16.msra.mxu3 %v2126_v25  ;;  %v906_v48 = vld [vmem:[#allocation1 + $0x12] sm:$0xff]  ;;  %v907_v49 = vld [vmem:[#allocation1 + $0x1b] sm:$0xff]  ;;  %v905_v52 = vld [vmem:[#allocation1 + $0x9] sm:$0xff] }
  0xea   : > { %1308 = vmatpush.bf16.msra.mxu0 %v2101_v27  ;;  %v904_v51 = vld [vmem:[#allocation1] sm:$0xff]  ;;  %v2133_v63 = vld [vmem:[%s2289_s11 + $0x118] sm:$0xff]  ;;  %v2132_v3 = vld [vmem:[%s2289_s11 + $0x110] sm:$0xff] }
  0xeb   : > { %1321 = vmatpush.bf16.msra.mxu1 %v2109_v28  ;;  %v2158_v62 = vld [vmem:[%s2289_s11 + $0x1e0] sm:$0xff]  ;;  %v2141_v0 = vld [vmem:[%s2289_s11 + $0x158] sm:$0xff]  ;;  %v2140_v4 = vld [vmem:[%s2289_s11 + $0x150] sm:$0xff] }
  0xec   : > { %1334 = vmatpush.bf16.msra.mxu2 %v2117_v29  ;;  %v2149_v1 = vld [vmem:[%s2289_s11 + $0x198] sm:$0xff]  ;;  %v2148_v5 = vld [vmem:[%s2289_s11 + $0x190] sm:$0xff]  ;;  %v2131_v7 = vld [vmem:[%s2289_s11 + $0x108] sm:$0xff] }
  0xed   : > { %1347 = vmatpush.bf16.msra.mxu3 %v2125_v30  ;;  %v2157_v2 = vld [vmem:[%s2289_s11 + $0x1d8] sm:$0xff]  ;;  %v2156_v6 = vld [vmem:[%s2289_s11 + $0x1d0] sm:$0xff]  ;;  %v2139_v8 = vld [vmem:[%s2289_s11 + $0x148] sm:$0xff] }
  0xee   : > { %1309 = vmatpush.bf16.msra.mxu0 %v2100_v31  ;;  %v2147_v9 = vld [vmem:[%s2289_s11 + $0x188] sm:$0xff]  ;;  %v2130_v11 = vld [vmem:[%s2289_s11 + $0x100] sm:$0xff]  ;;  %v910_v17 = vld [vmem:[#allocation1 + $0x36] sm:$0xff] }
  0xef   : > { %1322 = vmatpush.bf16.msra.mxu1 %v2108_v32  ;;  %v2155_v10 = vld [vmem:[%s2289_s11 + $0x1c8] sm:$0xff]  ;;  %v2138_v12 = vld [vmem:[%s2289_s11 + $0x140] sm:$0xff] }
  0xf0   : > { %1335 = vmatpush.bf16.msra.mxu2 %v2116_v33  ;;  %v2146_v13 = vld [vmem:[%s2289_s11 + $0x180] sm:$0xff]  ;;  %v909_v16 = vld [vmem:[#allocation1 + $0x2d] sm:$0xff] }
  0xf1   : > { %1348 = vmatpush.bf16.msra.mxu3 %v2124_v34  ;;  %v2154_v14 = vld [vmem:[%s2289_s11 + $0x1c0] sm:$0xff] }
  0xf2   : > { %1310 = vmatpush.bf16.msra.mxu0 %v2099_v35  ;;  %v908_v15 = vld [vmem:[#allocation1 + $0x24] sm:$0xff] }
  0xf3   : > { %1323 = vmatpush.bf16.msra.mxu1 %v2107_v36  ;;  %v911_v18 = vld [vmem:[#allocation1 + $0x3f] sm:$0xff] }
  0xf4   : > { %1336 = vmatpush.bf16.msra.mxu2 %v2115_v37 }
  0xf5   : > { %1349 = vmatpush.bf16.msra.mxu3 %v2123_v38 }
  0xf6   : > { %1311 = vmatpush.bf16.msra.mxu0 %v2098_v39  ;;  %v772_v39 = vld [vmem:[#allocation2] sm:$0x3] }
  0xf7   : > { %1324 = vmatpush.bf16.msra.mxu1 %v2106_v40 }
  0xf8   : > { %1337 = vmatpush.bf16.msra.mxu2 %v2114_v41 }
  0xf9   : > { %1350 = vmatpush.bf16.msra.mxu3 %v2122_v42  ;;  %1312 = vmatmul.bf16.vlgmr.msra.gmra.mxu0 %v904_v51 }
  0xfa   : > { %1356 = vmatpush.bf16.msrb.mxu0 %v2137_v43  ;;  %1325 = vmatmul.bf16.vlgmr.msra.gmra.mxu1 %v905_v52 }
  0xfb   : > { %1369 = vmatpush.bf16.msrb.mxu1 %v2145_v44  ;;  %1338 = vmatmul.bf16.vlgmr.msra.gmra.mxu2 %v906_v48 }
  0xfc   : > { %1382 = vmatpush.bf16.msrb.mxu2 %v2153_v45  ;;  %1351 = vmatmul.bf16.vlgmr.msra.gmra.mxu3 %v907_v49 }
  0xfd   : > { %1395 = vmatpush.bf16.msrb.mxu3 %v2161_v46 }
  0xfe   : > { %1357 = vmatpush.bf16.msrb.mxu0 %v2136_v47 }
  0xff   : > { %1370 = vmatpush.bf16.msrb.mxu1 %v2144_v50 }
 0x100   : > { %1383 = vmatpush.bf16.msrb.mxu2 %v2152_v53 }
 0x101   : > { %1396 = vmatpush.bf16.msrb.mxu3 %v2160_v54 }
 0x102   : > { %1358 = vmatpush.bf16.msrb.mxu0 %v2135_v55 }
 0x103   : > { %1371 = vmatpush.bf16.msrb.mxu1 %v2143_v56 }
 0x104   : > { %1384 = vmatpush.bf16.msrb.mxu2 %v2151_v57 }
 0x105   : > { %1397 = vmatpush.bf16.msrb.mxu3 %v2159_v58 }
 0x106   : > { %1359 = vmatpush.bf16.msrb.mxu0 %v2134_v59 }
 0x107   : > { %1372 = vmatpush.bf16.msrb.mxu1 %v2142_v60 }
 0x108   : > { %1385 = vmatpush.bf16.msrb.mxu2 %v2150_v61 }
 0x109   : > { %1398 = vmatpush.bf16.msrb.mxu3 %v2158_v62 }
 0x10a   : > { %1360 = vmatpush.bf16.msrb.mxu0 %v2133_v63 }
 0x10b   : > { %1373 = vmatpush.bf16.msrb.mxu1 %v2141_v0 }
 0x10c   : > { %1386 = vmatpush.bf16.msrb.mxu2 %v2149_v1 }
 0x10d   : > { %1399 = vmatpush.bf16.msrb.mxu3 %v2157_v2 }
 0x10e   : > { %1361 = vmatpush.bf16.msrb.mxu0 %v2132_v3 }
 0x10f   : > { %1374 = vmatpush.bf16.msrb.mxu1 %v2140_v4 }
 0x110   : > { %1387 = vmatpush.bf16.msrb.mxu2 %v2148_v5 }
 0x111   : > { %1400 = vmatpush.bf16.msrb.mxu3 %v2156_v6 }
 0x112   : > { %1362 = vmatpush.bf16.msrb.mxu0 %v2131_v7 }
 0x113   : > { %1375 = vmatpush.bf16.msrb.mxu1 %v2139_v8 }
 0x114   : > { %1388 = vmatpush.bf16.msrb.mxu2 %v2147_v9 }
 0x115   : > { %1401 = vmatpush.bf16.msrb.mxu3 %v2155_v10 }
 0x116   : > { %1363 = vmatpush.bf16.msrb.mxu0 %v2130_v11 }
 0x117   : > { %1376 = vmatpush.bf16.msrb.mxu1 %v2138_v12 }
 0x118   : > { %1389 = vmatpush.bf16.msrb.mxu2 %v2146_v13 }
 0x119   : > { %1402 = vmatpush.bf16.msrb.mxu3 %v2154_v14  ;;  %1364 = vmatmul.bf16.vlgmr.msrb.gmra.mxu0 %v908_v15 }
 0x11a   : > { %1377 = vmatmul.bf16.vlgmr.msrb.gmra.mxu1 %v909_v16 }
 0x11b   : > { %1390 = vmatmul.bf16.vlgmr.msrb.gmra.mxu2 %v910_v17 }
 0x11c   : > { %1403 = vmatmul.bf16.vlgmr.msrb.gmra.mxu3 %v911_v18 }
 0x176   : > { %v1313_v19 = vpop.f32.mrf.mxu0 }
 0x177   : > { %v1326_v20 = vpop.f32.mrf.mxu1 }
 0x178   : > { %v1327_v27 = vadd.f32 %v1326_v20, %v1313_v19 }
 0x17e   : > { %v1339_v21 = vpop.f32.mrf.mxu2  ;;  %v1315_v23 = vpop.f32.mrf.mxu0 }
 0x17f   : > { %v1352_v22 = vpop.f32.mrf.mxu3  ;;  %v1328_v24 = vpop.f32.mrf.mxu1  ;;  %v1340_v28 = vadd.f32 %v1339_v21, %v1327_v27 }
 0x181   : > { %v1353_v29 = vadd.f32 %v1352_v22, %v1340_v28 }
 0x186   : > { %v1341_v25 = vpop.f32.mrf.mxu2 }
 0x187   : > { %v1354_v26 = vpop.f32.mrf.mxu3 }
 0x196   : > { %v1365_v30 = vpop.f32.mrf.mxu0 }
 0x197   : > { %v1378_v31 = vpop.f32.mrf.mxu1  ;;  %v1366_v32 = vadd.f32 %v1365_v30, %v1353_v29 }
 0x199   : > { %v1379_v33 = vadd.f32 %v1378_v31, %v1366_v32 }
 0x19e   : > { %v1391_v34 = vpop.f32.mrf.mxu2  ;;  %v1367_v37 = vpop.f32.mrf.mxu0 }
 0x19f   : > { %v1404_v35 = vpop.f32.mrf.mxu3  ;;  %v1392_v36 = vadd.f32 %v1391_v34, %v1379_v33  ;;  %v1380_v38 = vpop.f32.mrf.mxu1 }
 0x1a1   : > { %v1405_v40 = vadd.f32 %v1404_v35, %v1392_v36 }
 0x1a3   : > { %v1408_v41 = vadd.f32 %v1405_v40, %v772_v39  ;;  %1413 = sbr.rel (%p2013_p6) target bundleno = 590 (0x24e), region = 56 }
 0x1a5   : > { %1409 = vst [vmem:[#allocation2] sm:$0x3] %v1408_v41 }
 0x1a6   : > { %v1393_v42 = vpop.f32.mrf.mxu2 }
 0x1a7   : > { %v1406_v43 = vpop.f32.mrf.mxu3 }
 0x1a8   : > { %v2169_v44 = vld [vmem:[%s2551_s5 + $0x38] sm:$0xff]  ;;  %v2168_v45 = vld [vmem:[%s2551_s5 + $0x30] sm:$0xff]  ;;  %v2167_v46 = vld [vmem:[%s2551_s5 + $0x28] sm:$0xff]  ;;  %vm1498_vm0 = vcmask 50176  }
 0x1a9   : > { %1485 = vmatpush.bf16.msra.mxu0 %v2169_v44  ;;  %v2166_v47 = vld [vmem:[%s2551_s5 + $0x20] sm:$0xff]  ;;  %v2165_v48 = vld [vmem:[%s2551_s5 + $0x18] sm:$0xff]  ;;  %v2164_v49 = vld [vmem:[%s2551_s5 + $0x10] sm:$0xff] }
 0x1aa   : > { %v2163_v50 = vld [vmem:[%s2551_s5 + $0x8] sm:$0xff]  ;;  %v2162_v53 = vld [vmem:[%s2551_s5] sm:$0xff] }
 0x1ab   : > { %v2186_v55 = vld [vmem:[%s2552_s6] ss:$0 sm:$0xff] }
 0x1ac   : > { %v1414_v51 = vld [vmem:[#allocation2] sm:$0x3] }
 0x1ad   : > { %1486 = vmatpush.bf16.msra.mxu0 %v2168_v45  ;;  %v1415_v52 = vmax.f32 %v1414_v51, 0.0 }
 0x1af   : > { %v1416_v54 = vpack.c.bf16 %v1415_v52, %v1415_v52 }
 0x1b1   : > { %1487 = vmatpush.bf16.msra.mxu0 %v2167_v46 }
 0x1b5   : > { %1488 = vmatpush.bf16.msra.mxu0 %v2166_v47 }
 0x1b9   : > { %1489 = vmatpush.bf16.msra.mxu0 %v2165_v48 }
 0x1bd   : > { %1490 = vmatpush.bf16.msra.mxu0 %v2164_v49 }
 0x1c1   : > { %1491 = vmatpush.bf16.msra.mxu0 %v2163_v50 }
 0x1c5   : > { %1492 = vmatpush.bf16.msra.mxu0 %v2162_v53 }
 0x1c8   : > { %1493 = vmatmul.bf16.vlgmr.msra.gmra.mxu0 %v1416_v54 }
 0x245   : > { %v1494_v56 = vpop.f32.mrf.mxu0 }
 0x246   : > { %v1495_v57 = vadd.f32 %v2186_v55, %v1494_v56 }
 0x248   : > { %1499 = vst.msk [vmem:[#allocation3] sm:$0x3] %vm1498_vm0, %v1495_v57 }
 0x24d   : > { %v1496_v58 = vpop.f32.mrf.mxu0 }
 0x24e PF: > { %p2174_p7 = scmp.eq.s32.totalorder %s2274_s25, 7  ;;  %s2227_s21 = smov [#allocation3]  }
 0x24f   : > { %s1506_s22 = sshll.u32 %s2227_s21, 4  ;;  %s1508_s30 = sshll.u32 %s2553_s7, 4  ;;  %s1507_s22 = int_to_ptr.vmem [resolvable:$true] %s1506_s22  ;;  %s1509_s30 = int_to_ptr.hbm [resolvable:$true] %s1508_s30 }
 0x250   : > { %2171 = dma.vmem_to_hbm [thread:$0]  (%p2174_p7), %s1507_s22, 32, %s1509_s30, [#allocation4]  }
 0x251   : > { %2220 = dma.done.wait (%p2174_p7), [#allocation4], 32  }
 0x252   : > { %2222 = vsyncadd (%p2174_p7), [#allocation4], 4294967264 }
 0x253 PF: > { %s18_s24 = sadd.s32 1, %s2225_s24  }
 0x254   : > { %p15_p8 = scmp.ge.s32.totalorder %s18_s24, 10  }
 0x256   :  { %17 = sbr.rel (!%p15_p8) target bundleno = 1 (0x1), region = 86 }
 0x25b   :  { %1522 = vsyncpa [#allocation4], 1 }
 0x25c   :  { %1524 = vsyncpa [#allocation4 + $0x1], 1 }

</bundles_post_ra>
